<compile_context>
chip_gen: v5e
topology: v5e:2x2
jax: 0.10.0
libtpu: 0.0.40
codegen_flags: <defaults>
</compile_context>

<pallas_src>
import functools

import jax
import jax.numpy as jnp
from jax.experimental import pallas as pl
from jax.experimental.pallas import tpu as pltpu


def _round_up(x, m):
    return (x + m - 1) // m * m


def _mlp_kernel(*refs, num_layers, compute_dtype):
    # refs = (x_ref, w0_ref, b0_ref, ..., w{L-1}_ref, b{L-1}_ref, o_ref)
    # x_ref: (TM, K0)   w_l: (K_l, N_l_p)   b_l: (1, N_l_p)   o_ref: (TM, N_last_p)
    x_ref = refs[0]
    o_ref = refs[-1]

    h = x_ref[...]  # compute dtype (bf16)
    for l in range(num_layers):
        w_ref = refs[1 + 2 * l]
        b_ref = refs[2 + 2 * l]
        # MXU matmul with f32 accumulation; bias add (+ ReLU) in f32.
        acc = jnp.dot(h, w_ref[...], preferred_element_type=jnp.float32)
        acc = acc + b_ref[...].astype(jnp.float32)  # (1, N) broadcast over rows
        if l < num_layers - 1:
            h = jnp.maximum(acc, 0.0).astype(compute_dtype)
        else:
            o_ref[...] = acc.astype(o_ref.dtype)


def init_params(key, depth):
    """Deterministic params matching nn.Linear shapes (stored as (in, out))."""
    dims = [28 * 28] + [512 for _ in range(depth)] + [10]
    params = []
    for i in range(1, len(dims)):
        fan_in, fan_out = dims[i - 1], dims[i]
        key, kw, kb = jax.random.split(key, 3)
        bound = 1.0 / (fan_in ** 0.5)
        w = jax.random.uniform(kw, (fan_in, fan_out), jnp.float32, -bound, bound)
        b = jax.random.uniform(kb, (fan_out,), jnp.float32, -bound, bound)
        params.append((w, b))
    return params


def prepare_params(params, compute_dtype=jnp.bfloat16):
    """One-time cast + lane-pad of weights/biases (hoisted out of forward).

    The K (input) extent of each weight is kept un-padded (full-extent blocks
    are legal; 784 and 512 are bf16-sublane aligned). Only the output extent
    is padded to a multiple of 128 so matmuls / the final store stay
    lane-dense. Returns a list of (w_padded, b_padded, n_out_original).
    """
    prepped = []
    for (w, b) in params:
        kin, nout = w.shape
        nout_p = _round_up(nout, 128)
        w_p = jnp.zeros((kin, nout_p), compute_dtype).at[:, :nout].set(
            w.astype(compute_dtype))
        b_p = jnp.zeros((1, nout_p), compute_dtype).at[:, :nout].set(
            b.reshape(1, nout).astype(compute_dtype))
        prepped.append((w_p, b_p, nout))
    return prepped


def _choose_batch_tiling(batch):
    """Pick (TM, grid) minimizing padded rows while keeping >= 2 tiles (so
    v7x's two TensorCores both get batch tiles) and <= 512 rows per tile."""
    if batch <= 8:
        return _round_up(max(batch, 1), 8), 1
    n_tiles = max(2, -(-batch // 512))        # ceil(batch/512), at least 2
    if n_tiles > 2 and (n_tiles % 2):
        n_tiles += 1                          # even grid splits across 2 TCs
    tm = _round_up(-(-batch // n_tiles), 8)   # sublane-aligned rows per tile
    return tm, n_tiles


def neural_network_forward(prepped, x_nchw, *, compute_dtype=jnp.bfloat16,
                           out_dtype=jnp.float32):
    """Fused Pallas forward: flatten -> (Linear -> ReLU)*depth -> Linear."""
    B = x_nchw.shape[0]
    x = x_nchw.reshape(B, -1).astype(compute_dtype)
    K0 = x.shape[1]
    num_layers = len(prepped)
    n_last = prepped[-1][2]
    n_out_p = prepped[-1][0].shape[1]

    TM, grid = _choose_batch_tiling(B)
    B_pad = TM * grid

    # Zero-pad batch rows only (K stays at 784).
    if B_pad != B:
        x_p = jnp.zeros((B_pad, K0), compute_dtype).at[:B].set(x)
    else:
        x_p = x

    in_specs = [pl.BlockSpec((TM, K0), lambda i: (i, 0))]
    wb_args = []
    for (w_p, b_p, _) in prepped:
        wb_args += [w_p, b_p]
        in_specs += [
            pl.BlockSpec(w_p.shape, lambda i: (0, 0)),  # resident weights
            pl.BlockSpec(b_p.shape, lambda i: (0, 0)),  # resident bias
        ]

    # Explicit VMEM budget: resident weights (x2 in case the pipeliner
    # double-buffers them) + double-buffered x/out tiles + f32 accumulators.
    bpe = jnp.dtype(compute_dtype).itemsize
    w_bytes = sum(w.size * bpe + b.size * bpe for (w, b, _) in prepped)
    widest = max([K0] + [w.shape[1] for (w, _, _) in prepped])
    tile_bytes = TM * K0 * bpe + TM * n_out_p * bpe
    acc_bytes = TM * widest * 4
    vmem_limit = int(min(max(2 * w_bytes + 2 * tile_bytes + 3 * acc_bytes
                             + (8 << 20), 32 << 20), 100 << 20))

    kernel = functools.partial(_mlp_kernel, num_layers=num_layers,
                               compute_dtype=compute_dtype)

    out_p = pl.pallas_call(
        kernel,
        # bf16 store halves the lane-padded output writeback; logits are cast
        # back to `out_dtype` after slicing.
        out_shape=jax.ShapeDtypeStruct((B_pad, n_out_p), compute_dtype),
        grid_spec=pltpu.PrefetchScalarGridSpec(
            num_scalar_prefetch=0,
            grid=(grid,),
            in_specs=in_specs,
            out_specs=pl.BlockSpec((TM, n_out_p), lambda i: (i, 0)),
        ),
        compiler_params=pltpu.CompilerParams(
            # Batch tiles are independent -> shard across TCs on v7x.
            dimension_semantics=("parallel",),
            vmem_limit_bytes=vmem_limit,
        ),
    )(x_p, *wb_args)

    return out_p[:B, :n_last].astype(out_dtype)


if __name__ == "__main__":
    key = jax.random.PRNGKey(0)
    depth = 2
    kparams, kx = jax.random.split(key)
    params = init_params(kparams, depth)

    # One-time weight preprocessing (hoisted out of the per-call path).
    prepped = prepare_params(params)

    # Small batch, MNIST-like NCHW input (B, 1, 28, 28)
    x = jax.random.normal(kx, (2, 1, 28, 28), jnp.float32)

    out = neural_network_forward(prepped, x)
    out = jax.block_until_ready(out)
    assert out.shape == (2, 10)

    # Reference in plain JAX using the SAME numerics as the kernel:
    # bf16 weights/activations, f32 accumulation, bf16 logits store.
    cdt = jnp.bfloat16
    h = x.reshape(x.shape[0], -1).astype(cdt)
    for (w, b) in params[:-1]:
        a = jnp.dot(h, w.astype(cdt), preferred_element_type=jnp.float32)
        a = a + b.astype(cdt).astype(jnp.float32)
        h = jnp.maximum(a, 0.0).astype(cdt)
    w, b = params[-1]
    ref = jnp.dot(h, w.astype(cdt), preferred_element_type=jnp.float32)
    ref = ref + b.astype(cdt).astype(jnp.float32)
    ref = ref.astype(cdt).astype(jnp.float32)

    assert jnp.allclose(out, ref, atol=2e-2, rtol=2e-2), (
        f"max abs err {jnp.max(jnp.abs(out - ref))}")

    print("KERNEL_OK")
</pallas_src>

<mosaic_0001>
module attributes {stable_mosaic.version = 11 : i64} {
  func.func @_mlp_kernel(%arg0: i32, %arg1: memref<8x784xbf16, #tpu.memory_space<vmem>>, %arg2: memref<784x512xbf16, #tpu.memory_space<vmem>>, %arg3: memref<1x512xbf16, #tpu.memory_space<vmem>>, %arg4: memref<512x512xbf16, #tpu.memory_space<vmem>>, %arg5: memref<1x512xbf16, #tpu.memory_space<vmem>>, %arg6: memref<512x128xbf16, #tpu.memory_space<vmem>>, %arg7: memref<1x128xbf16, #tpu.memory_space<vmem>>, %arg8: memref<8x128xbf16, #tpu.memory_space<vmem>>) attributes {dimension_semantics = [#tpu.dimension_semantics<parallel>], iteration_bounds = array<i64: 1>, scalar_prefetch = 0 : i64, scratch_operands = 0 : i64, tpu.core_type = #tpu.core_type<tc>, window_params = [{transform_indices = @transform_0, window_bounds = array<i64: 8, 784>}, {pipeline_mode = #tpu.pipeline_mode<synchronous>, transform_indices = @transform_1, window_bounds = array<i64: 784, 512>}, {pipeline_mode = #tpu.pipeline_mode<synchronous>, transform_indices = @transform_2, window_bounds = array<i64: 1, 512>}, {pipeline_mode = #tpu.pipeline_mode<synchronous>, transform_indices = @transform_3, window_bounds = array<i64: 512, 512>}, {pipeline_mode = #tpu.pipeline_mode<synchronous>, transform_indices = @transform_4, window_bounds = array<i64: 1, 512>}, {pipeline_mode = #tpu.pipeline_mode<synchronous>, transform_indices = @transform_5, window_bounds = array<i64: 512, 128>}, {pipeline_mode = #tpu.pipeline_mode<synchronous>, transform_indices = @transform_6, window_bounds = array<i64: 1, 128>}, {transform_indices = @transform_7, window_bounds = array<i64: 8, 128>}]} {
    %c0 = arith.constant 0 : index
    %c0_0 = arith.constant 0 : index
    %0 = vector.load %arg1[%c0, %c0_0] : memref<8x784xbf16, #tpu.memory_space<vmem>>, vector<8x784xbf16>
    %c0_1 = arith.constant 0 : index
    %c0_2 = arith.constant 0 : index
    %1 = vector.load %arg2[%c0_1, %c0_2] : memref<784x512xbf16, #tpu.memory_space<vmem>>, vector<784x512xbf16>
    %cst = arith.constant dense<0.000000e+00> : vector<8x512xf32>
    %2 = tpu.matmul %0, %1, %cst {dimension_numbers = #tpu.dot_dimension_numbers<[1], [0], [0], [1], [0, 0, 1, 1], [], []>} : vector<8x784xbf16>, vector<784x512xbf16>, vector<8x512xf32> -> vector<8x512xf32>
    %c0_3 = arith.constant 0 : index
    %c0_4 = arith.constant 0 : index
    %3 = vector.load %arg3[%c0_3, %c0_4] : memref<1x512xbf16, #tpu.memory_space<vmem>>, vector<1x512xbf16>
    %4 = arith.extf %3 : vector<1x512xbf16> to vector<1x512xf32>
    %5 = vector.broadcast %4 : vector<1x512xf32> to vector<8x512xf32>
    %6 = arith.addf %2, %5 : vector<8x512xf32>
    %cst_5 = arith.constant 0.000000e+00 : f32
    %7 = vector.broadcast %cst_5 : f32 to vector<8x512xf32>
    %8 = arith.maximumf %6, %7 : vector<8x512xf32>
    %9 = arith.truncf %8 : vector<8x512xf32> to vector<8x512xbf16>
    %c0_6 = arith.constant 0 : index
    %c0_7 = arith.constant 0 : index
    %10 = vector.load %arg4[%c0_6, %c0_7] : memref<512x512xbf16, #tpu.memory_space<vmem>>, vector<512x512xbf16>
    %cst_8 = arith.constant dense<0.000000e+00> : vector<8x512xf32>
    %11 = tpu.matmul %9, %10, %cst_8 {dimension_numbers = #tpu.dot_dimension_numbers<[1], [0], [0], [1], [0, 0, 1, 1], [], []>} : vector<8x512xbf16>, vector<512x512xbf16>, vector<8x512xf32> -> vector<8x512xf32>
    %c0_9 = arith.constant 0 : index
    %c0_10 = arith.constant 0 : index
    %12 = vector.load %arg5[%c0_9, %c0_10] : memref<1x512xbf16, #tpu.memory_space<vmem>>, vector<1x512xbf16>
    %13 = arith.extf %12 : vector<1x512xbf16> to vector<1x512xf32>
    %14 = vector.broadcast %13 : vector<1x512xf32> to vector<8x512xf32>
    %15 = arith.addf %11, %14 : vector<8x512xf32>
    %cst_11 = arith.constant 0.000000e+00 : f32
    %16 = vector.broadcast %cst_11 : f32 to vector<8x512xf32>
    %17 = arith.maximumf %15, %16 : vector<8x512xf32>
    %18 = arith.truncf %17 : vector<8x512xf32> to vector<8x512xbf16>
    %c0_12 = arith.constant 0 : index
    %c0_13 = arith.constant 0 : index
    %19 = vector.load %arg6[%c0_12, %c0_13] : memref<512x128xbf16, #tpu.memory_space<vmem>>, vector<512x128xbf16>
    %cst_14 = arith.constant dense<0.000000e+00> : vector<8x128xf32>
    %20 = tpu.matmul %18, %19, %cst_14 {dimension_numbers = #tpu.dot_dimension_numbers<[1], [0], [0], [1], [0, 0, 1, 1], [], []>} : vector<8x512xbf16>, vector<512x128xbf16>, vector<8x128xf32> -> vector<8x128xf32>
    %c0_15 = arith.constant 0 : index
    %c0_16 = arith.constant 0 : index
    %21 = vector.load %arg7[%c0_15, %c0_16] : memref<1x128xbf16, #tpu.memory_space<vmem>>, vector<1x128xbf16>
    %22 = arith.extf %21 : vector<1x128xbf16> to vector<1x128xf32>
    %23 = vector.broadcast %22 : vector<1x128xf32> to vector<8x128xf32>
    %24 = arith.addf %20, %23 : vector<8x128xf32>
    %25 = arith.truncf %24 : vector<8x128xf32> to vector<8x128xbf16>
    %c0_17 = arith.constant 0 : index
    %c0_18 = arith.constant 0 : index
    %26 = vector.load %arg8[%c0_17, %c0_18] : memref<8x128xbf16, #tpu.memory_space<vmem>>, vector<8x128xbf16>
    tpu.vector_store %arg8[%c0_17, %c0_18], %25 {strides = array<i32>} : memref<8x128xbf16, #tpu.memory_space<vmem>>, vector<8x128xbf16>,
    return
  }
  func.func @transform_0(%arg0: i32) -> (i32, i32) {
    %c0_i32 = arith.constant 0 : i32
    %c0_i32_0 = arith.constant 0 : i32
    return %arg0, %c0_i32 : i32, i32
  }
  func.func @transform_1(%arg0: i32) -> (i32, i32) {
    %c0_i32 = arith.constant 0 : i32
    %c0_i32_0 = arith.constant 0 : i32
    %c0_i32_1 = arith.constant 0 : i32
    return %c0_i32, %c0_i32_0 : i32, i32
  }
  func.func @transform_2(%arg0: i32) -> (i32, i32) {
    %c0_i32 = arith.constant 0 : i32
    %c0_i32_0 = arith.constant 0 : i32
    %c0_i32_1 = arith.constant 0 : i32
    return %c0_i32, %c0_i32_0 : i32, i32
  }
  func.func @transform_3(%arg0: i32) -> (i32, i32) {
    %c0_i32 = arith.constant 0 : i32
    %c0_i32_0 = arith.constant 0 : i32
    %c0_i32_1 = arith.constant 0 : i32
    return %c0_i32, %c0_i32_0 : i32, i32
  }
  func.func @transform_4(%arg0: i32) -> (i32, i32) {
    %c0_i32 = arith.constant 0 : i32
    %c0_i32_0 = arith.constant 0 : i32
    %c0_i32_1 = arith.constant 0 : i32
    return %c0_i32, %c0_i32_0 : i32, i32
  }
  func.func @transform_5(%arg0: i32) -> (i32, i32) {
    %c0_i32 = arith.constant 0 : i32
    %c0_i32_0 = arith.constant 0 : i32
    %c0_i32_1 = arith.constant 0 : i32
    return %c0_i32, %c0_i32_0 : i32, i32
  }
  func.func @transform_6(%arg0: i32) -> (i32, i32) {
    %c0_i32 = arith.constant 0 : i32
    %c0_i32_0 = arith.constant 0 : i32
    %c0_i32_1 = arith.constant 0 : i32
    return %c0_i32, %c0_i32_0 : i32, i32
  }
  func.func @transform_7(%arg0: i32) -> (i32, i32) {
    %c0_i32 = arith.constant 0 : i32
    %c0_i32_0 = arith.constant 0 : i32
    return %arg0, %c0_i32 : i32, i32
  }
}

</mosaic_0001>

<bundles_post_ra>
// kernel: tpu_custom_call.1
= control target key start
LH: loop header
LB: loop body
LE: loop exit
PB: predicated region body
PF: predicated region fallthrough
CT: control target
= control target key end

     0   :  { %12 = vsyncpa [#allocation3], 0  ;;  %s5224_s0 = inlined_call_operand.hbm [shape: bf16[8,784], index: 0, kind: input, shape index: {}]   ;;  %s5225_s1 = inlined_call_operand.hbm [shape: bf16[784,512], index: 1, kind: input, shape index: {}]   ;;  %s5226_s2 = inlined_call_operand.hbm [shape: bf16[1,512], index: 2, kind: input, shape index: {}]   ;;  %s5227_s3 = inlined_call_operand.hbm [shape: bf16[512,512], index: 3, kind: input, shape index: {}]   ;;  %s5228_s4 = inlined_call_operand.hbm [shape: bf16[1,512], index: 4, kind: input, shape index: {}]   ;;  %s5229_s5 = inlined_call_operand.hbm [shape: bf16[512,128], index: 5, kind: input, shape index: {}]   ;;  %s5230_s6 = inlined_call_operand.vmem [shape: bf16[1,128], index: 6, kind: input, shape index: {}]   ;;  %s5231_s7 = inlined_call_operand.hbm [shape: bf16[8,128], index: 7, kind: output, shape index: {}]  }
   0x1   :  { %13 = vsyncpa [#allocation6], 0 }
   0x2   :  { %14 = vsyncpa [#allocation9], 0 }
   0x3   :  { %15 = vsyncpa [#allocation12], 0  ;;  %s32_s26 = sshll.u32 %s5225_s1, 4  ;;  %s33_s26 = int_to_ptr.hbm [resolvable:$true] %s32_s26 }
   0x4   :  { %16 = vsyncpa [#allocation4], 0  ;;  %s5016_s27 = smov [#allocation5]   ;;  %s56_s8 = sshll.u32 %s5227_s3, 4  ;;  %s57_s8 = int_to_ptr.hbm [resolvable:$true] %s56_s8 }
   0x5   :  { %s34_s28 = sshll.u32 %s5016_s27, 4  ;;  %s5017_s9 = smov 256   ;;  %s35_s28 = int_to_ptr.vmem [resolvable:$true] %s34_s28 }
   0x6   :  { %s5018_s10 = smov 16   ;;  %s5019_s11 = smov [#allocation8]  }
   0x7   :  { %40 = dma.hbm_to_vmem [thread:$0]  %s33_s26, 25088, %s35_s28, [#allocation6], %s5017_s9, %s5017_s9, %s5018_s10  }
   0x8   :  { %s58_s12 = sshll.u32 %s5019_s11, 4  ;;  %s22_s15 = sshll.u32 %s5224_s0, 4  ;;  %s59_s12 = int_to_ptr.vmem [resolvable:$true] %s58_s12  ;;  %s23_s15 = int_to_ptr.hbm [resolvable:$true] %s22_s15 }
   0x9   :  { %64 = dma.hbm_to_vmem [thread:$0]  %s57_s8, 16384, %s59_s12, [#allocation9], %s5017_s9, %s5017_s9, %s5018_s10  }
   0xa   :  { %s46_s17 = sshll.u32 %s5226_s2, 4  ;;  %s5020_s18 = smov [#allocation2]   ;;  %s47_s17 = int_to_ptr.hbm [resolvable:$true] %s46_s17 }
   0xb   :  { %s24_s19 = sshll.u32 %s5020_s18, 4  ;;  %s5021_s3 = smov [#allocation7]   ;;  %s25_s19 = int_to_ptr.vmem [resolvable:$true] %s24_s19 }
   0xc   :  { %27 = dma.hbm_to_vmem [thread:$0]  %s23_s15, 448, %s25_s19, [#allocation3]  }
   0xd   :  { %s48_s20 = sshll.u32 %s5021_s3, 4  ;;  %s70_s23 = sshll.u32 %s5228_s4, 4  ;;  %s49_s20 = int_to_ptr.vmem [resolvable:$true] %s48_s20  ;;  %s71_s23 = int_to_ptr.hbm [resolvable:$true] %s70_s23 }
   0xe   :  { %51 = dma.hbm_to_vmem [thread:$0]  %s47_s17, 64, %s49_s20, [#allocation6]  }
   0xf   :  { %s80_s25 = sshll.u32 %s5229_s5, 4  ;;  %s5022_s26 = smov [#allocation10]   ;;  %s81_s25 = int_to_ptr.hbm [resolvable:$true] %s80_s25 }
  0x10   :  { %s72_s2 = sshll.u32 %s5022_s26, 4  ;;  %s5023_s27 = smov [#allocation11]   ;;  %s73_s2 = int_to_ptr.vmem [resolvable:$true] %s72_s2 }
  0x11   :  { %75 = dma.hbm_to_vmem [thread:$0]  %s71_s23, 64, %s73_s2, [#allocation9]  }
  0x12   :  { %s82_s28 = sshll.u32 %s5023_s27, 4  ;;  %s5024_s29 = smov 64   ;;  %s83_s28 = int_to_ptr.vmem [resolvable:$true] %s82_s28 }
  0x13   :  { %s5025_s30 = smov 4  }
  0x14   :  { %88 = dma.hbm_to_vmem [thread:$0]  %s81_s25, 4096, %s83_s28, [#allocation12], %s5024_s29, %s5024_s29, %s5025_s30  }
  0x15   :  { %5006 = dma.done.wait [#allocation3], 448  }
  0x16   :  { %5007 = vsyncadd [#allocation3], 4294966848 }
  0x17   :  { %5008 = dma.done.wait [#allocation6], 25152  }
  0x18   :  { %5009 = vsyncadd [#allocation6], 4294942144 }
  0x19   :  { %5010 = dma.done.wait [#allocation9], 16448  }
  0x1a   :  { %5011 = vsyncadd [#allocation9], 4294950848 }
  0x1b   :  { %5012 = dma.done.wait [#allocation12], 4096  }
  0x1c   :  { %5013 = vsyncadd [#allocation12], 4294963200  ;;  %v3157_v0 = vld [vmem:[#allocation5 + $0xe0] sm:$0xf]  ;;  %v4501_v1 = vld [vmem:[#allocation5 + $0xec] sm:$0xf0] }
  0x1d   :  { %v3285_v2 = vld [vmem:[#allocation5 + $0x1e0] sm:$0xf]  ;;  %v3158_v3 = vor.u32 %v4501_v1, %v3157_v0  ;;  %v4533_v4 = vld [vmem:[#allocation5 + $0x1ec] sm:$0xf0]  ;;  %vm1335_vm0 = vcmask 130048   ;;  %s5026_s8 = smov [#allocation13]  }
  0x1e   :  { %v3413_v5 = vld [vmem:[#allocation5 + $0x2e0] sm:$0xf]  ;;  %v4565_v6 = vld [vmem:[#allocation5 + $0x2ec] sm:$0xf0]  ;;  %v3286_v7 = vor.u32 %v4533_v4, %v3285_v2  ;;  %s3028_s9 = sshll.u32 %s5026_s8, 4  ;;  %s3030_s12 = sshll.u32 %s5231_s7, 4  ;;  %s3029_s9 = int_to_ptr.vmem [resolvable:$true] %s3028_s9  ;;  %s3031_s12 = int_to_ptr.hbm [resolvable:$true] %s3030_s12 }
  0x1f   :  { %v3414_v8 = vor.u32 %v4565_v6, %v3413_v5  ;;  %v3541_v9 = vld [vmem:[#allocation5 + $0x3e0] sm:$0xf]  ;;  %v4597_v10 = vld [vmem:[#allocation5 + $0x3ec] sm:$0xf0]  ;;  %1339 = vmatpush.bf16.msra.mxu0 %v3158_v3 }
  0x20   :  { %v3141_v11 = vld [vmem:[#allocation5 + $0xc0] sm:$0xf]  ;;  %v3542_v12 = vor.u32 %v4597_v10, %v3541_v9  ;;  %v4497_v13 = vld [vmem:[#allocation5 + $0xcc] sm:$0xf0]  ;;  %1352 = vmatpush.bf16.msra.mxu1 %v3286_v7 }
  0x21   :  { %v3269_v14 = vld [vmem:[#allocation5 + $0x1c0] sm:$0xf]  ;;  %v4529_v15 = vld [vmem:[#allocation5 + $0x1cc] sm:$0xf0]  ;;  %1365 = vmatpush.bf16.msra.mxu2 %v3414_v8  ;;  %v3142_v16 = vor.u32 %v4497_v13, %v3141_v11 }
  0x22   :  { %v3270_v17 = vor.u32 %v4529_v15, %v3269_v14  ;;  %v3397_v18 = vld [vmem:[#allocation5 + $0x2c0] sm:$0xf]  ;;  %v4561_v19 = vld [vmem:[#allocation5 + $0x2cc] sm:$0xf0]  ;;  %1378 = vmatpush.bf16.msra.mxu3 %v3542_v12 }
  0x23   :  { %v3525_v20 = vld [vmem:[#allocation5 + $0x3c0] sm:$0xf]  ;;  %v3398_v21 = vor.u32 %v4561_v19, %v3397_v18  ;;  %v4593_v22 = vld [vmem:[#allocation5 + $0x3cc] sm:$0xf0]  ;;  %1340 = vmatpush.bf16.msra.mxu0 %v3142_v16 }
  0x24   :  { %v3125_v23 = vld [vmem:[#allocation5 + $0xa0] sm:$0xf]  ;;  %v4493_v24 = vld [vmem:[#allocation5 + $0xac] sm:$0xf0]  ;;  %v3526_v25 = vor.u32 %v4593_v22, %v3525_v20  ;;  %1353 = vmatpush.bf16.msra.mxu1 %v3270_v17 }
  0x25   :  { %v3253_v26 = vld [vmem:[#allocation5 + $0x1a0] sm:$0xf]  ;;  %v4525_v27 = vld [vmem:[#allocation5 + $0x1ac] sm:$0xf0]  ;;  %v3126_v29 = vor.u32 %v4493_v24, %v3125_v23  ;;  %1366 = vmatpush.bf16.msra.mxu2 %v3398_v21 }
  0x26   :  { %v3381_v28 = vld [vmem:[#allocation5 + $0x2a0] sm:$0xf]  ;;  %v4557_v30 = vld [vmem:[#allocation5 + $0x2ac] sm:$0xf0]  ;;  %v3254_v33 = vor.u32 %v4525_v27, %v3253_v26  ;;  %1379 = vmatpush.bf16.msra.mxu3 %v3526_v25 }
  0x27   :  { %v3509_v31 = vld [vmem:[#allocation5 + $0x3a0] sm:$0xf]  ;;  %v4589_v32 = vld [vmem:[#allocation5 + $0x3ac] sm:$0xf0]  ;;  %v3382_v34 = vor.u32 %v4557_v30, %v3381_v28  ;;  %1341 = vmatpush.bf16.msra.mxu0 %v3126_v29 }
  0x28   :  { %v3109_v35 = vld [vmem:[#allocation5 + $0x80] sm:$0xf]  ;;  %v4489_v36 = vld [vmem:[#allocation5 + $0x8c] sm:$0xf0]  ;;  %v3510_v38 = vor.u32 %v4589_v32, %v3509_v31  ;;  %1354 = vmatpush.bf16.msra.mxu1 %v3254_v33 }
  0x29   :  { %v3237_v37 = vld [vmem:[#allocation5 + $0x180] sm:$0xf]  ;;  %v4521_v39 = vld [vmem:[#allocation5 + $0x18c] sm:$0xf0]  ;;  %v3110_v44 = vor.u32 %v4489_v36, %v3109_v35  ;;  %1367 = vmatpush.bf16.msra.mxu2 %v3382_v34  ;;  %v4499_v34 = vld [vmem:[#allocation5 + $0xe4] sm:$0xf] }
  0x2a   :  { %v3365_v40 = vld [vmem:[#allocation5 + $0x280] sm:$0xf]  ;;  %v4553_v41 = vld [vmem:[#allocation5 + $0x28c] sm:$0xf0]  ;;  %v3238_v45 = vor.u32 %v4521_v39, %v3237_v37  ;;  %1380 = vmatpush.bf16.msra.mxu3 %v3510_v38  ;;  %v3159_v35 = vld [vmem:[#allocation5 + $0xf0] sm:$0xf0] }
  0x2b   :  { %v3493_v42 = vld [vmem:[#allocation5 + $0x380] sm:$0xf]  ;;  %v4585_v43 = vld [vmem:[#allocation5 + $0x38c] sm:$0xf0]  ;;  %v3366_v46 = vor.u32 %v4553_v41, %v3365_v40  ;;  %1342 = vmatpush.bf16.msra.mxu0 %v3110_v44  ;;  %v116_v37 = vld [vmem:[#allocation2] sm:$0xff] }
  0x2c   :  { %v3093_v47 = vld [vmem:[#allocation5 + $0x60] sm:$0xf]  ;;  %v4485_v48 = vld [vmem:[#allocation5 + $0x6c] sm:$0xf0]  ;;  %v3494_v50 = vor.u32 %v4585_v43, %v3493_v42  ;;  %1355 = vmatpush.bf16.msra.mxu1 %v3238_v45  ;;  %v335_v41 = vunpack.c.l.b16 %v116_v37 }
  0x2d   :  { %v3221_v49 = vld [vmem:[#allocation5 + $0x160] sm:$0xf]  ;;  %v4517_v51 = vld [vmem:[#allocation5 + $0x16c] sm:$0xf0]  ;;  %v3094_v56 = vor.u32 %v4485_v48, %v3093_v47  ;;  %1368 = vmatpush.bf16.msra.mxu2 %v3366_v46  ;;  %v4531_v46 = vld [vmem:[#allocation5 + $0x1e4] sm:$0xf] }
  0x2e   :  { %v3349_v52 = vld [vmem:[#allocation5 + $0x260] sm:$0xf]  ;;  %v4549_v53 = vld [vmem:[#allocation5 + $0x26c] sm:$0xf0]  ;;  %v3222_v57 = vor.u32 %v4517_v51, %v3221_v49  ;;  %1381 = vmatpush.bf16.msra.mxu3 %v3494_v50  ;;  %v3287_v47 = vld [vmem:[#allocation5 + $0x1f0] sm:$0xf0]  ;;  %v3162_v49 = vor.u32 %v4499_v34, %v3159_v35 }
  0x2f   :  { %v3477_v54 = vld [vmem:[#allocation5 + $0x360] sm:$0xf]  ;;  %v4581_v55 = vld [vmem:[#allocation5 + $0x36c] sm:$0xf0]  ;;  %v3350_v58 = vor.u32 %v4549_v53, %v3349_v52  ;;  %1343 = vmatpush.bf16.msra.mxu0 %v3094_v56  ;;  %v3143_v56 = vld [vmem:[#allocation5 + $0xd0] sm:$0xf0] }
  0x30   :  { %v3077_v59 = vld [vmem:[#allocation5 + $0x40] sm:$0xf]  ;;  %v4481_v60 = vld [vmem:[#allocation5 + $0x4c] sm:$0xf0]  ;;  %v3478_v62 = vor.u32 %v4581_v55, %v3477_v54  ;;  %1356 = vmatpush.bf16.msra.mxu1 %v3222_v57  ;;  %v4495_v55 = vld [vmem:[#allocation5 + $0xc4] sm:$0xf]  ;;  %v5087_v57 = vpack.c.b16 %v335_v41, %v335_v41 }
  0x31   :  { %v3205_v61 = vld [vmem:[#allocation5 + $0x140] sm:$0xf]  ;;  %v4513_v63 = vld [vmem:[#allocation5 + $0x14c] sm:$0xf0]  ;;  %v3078_v4 = vor.u32 %v4481_v60, %v3077_v59  ;;  %1369 = vmatpush.bf16.msra.mxu2 %v3350_v58  ;;  %v336_v58 = vunpack.c.h.b16 %v116_v37  ;;  %v3095_v34 = vld [vmem:[#allocation5 + $0x70] sm:$0xf0] }
  0x32   :  { %v3333_v0 = vld [vmem:[#allocation5 + $0x240] sm:$0xf]  ;;  %v4545_v1 = vld [vmem:[#allocation5 + $0x24c] sm:$0xf0]  ;;  %v3206_v5 = vor.u32 %v4513_v63, %v3205_v61  ;;  %1382 = vmatpush.bf16.msra.mxu3 %v3478_v62  ;;  %v3290_v61 = vor.u32 %v4531_v46, %v3287_v47  ;;  %v4527_v63 = vld [vmem:[#allocation5 + $0x1c4] sm:$0xf] }
  0x33   :  { %v3461_v2 = vld [vmem:[#allocation5 + $0x340] sm:$0xf]  ;;  %v4577_v3 = vld [vmem:[#allocation5 + $0x34c] sm:$0xf0]  ;;  %v3334_v6 = vor.u32 %v4545_v1, %v3333_v0  ;;  %1344 = vmatpush.bf16.msra.mxu0 %v3078_v4  ;;  %v3271_v0 = vld [vmem:[#allocation5 + $0x1d0] sm:$0xf0] }
  0x34   :  { %v3061_v7 = vld [vmem:[#allocation5 + $0x20] sm:$0xf]  ;;  %v4477_v8 = vld [vmem:[#allocation5 + $0x2c] sm:$0xf0]  ;;  %v3462_v10 = vor.u32 %v4577_v3, %v3461_v2  ;;  %1357 = vmatpush.bf16.msra.mxu1 %v3206_v5  ;;  %v3146_v2 = vor.u32 %v4495_v55, %v3143_v56  ;;  %v4479_v46 = vld [vmem:[#allocation5 + $0x44] sm:$0xf] }
  0x35   :  { %v3189_v9 = vld [vmem:[#allocation5 + $0x120] sm:$0xf]  ;;  %v4509_v11 = vld [vmem:[#allocation5 + $0x12c] sm:$0xf0]  ;;  %v3062_v17 = vor.u32 %v4477_v8, %v3061_v7  ;;  %1370 = vmatpush.bf16.msra.mxu2 %v3334_v6  ;;  %v4491_v7 = vld [vmem:[#allocation5 + $0xa4] sm:$0xf] }
  0x36   :  { %v3317_v12 = vld [vmem:[#allocation5 + $0x220] sm:$0xf]  ;;  %v4541_v13 = vld [vmem:[#allocation5 + $0x22c] sm:$0xf0]  ;;  %v3190_v21 = vor.u32 %v4509_v11, %v3189_v9  ;;  %1383 = vmatpush.bf16.msra.mxu3 %v3462_v10  ;;  %v3127_v8 = vld [vmem:[#allocation5 + $0xb0] sm:$0xf0]  ;;  %v5093_v9 = vpack.c.b16 %v336_v58, %v336_v58  ;;  %v3274_v10 = vor.u32 %v4527_v63, %v3271_v0 }
  0x37   :  { %v3445_v14 = vld [vmem:[#allocation5 + $0x320] sm:$0xf]  ;;  %v4573_v15 = vld [vmem:[#allocation5 + $0x32c] sm:$0xf0]  ;;  %v3318_v22 = vor.u32 %v4541_v13, %v3317_v12  ;;  %1345 = vmatpush.bf16.msra.mxu0 %v3062_v17  ;;  %v4523_v12 = vld [vmem:[#allocation5 + $0x1a4] sm:$0xf] }
  0x38   :  { %v3045_v16 = vld [vmem:[#allocation5] sm:$0xf]  ;;  %v4473_v18 = vld [vmem:[#allocation5 + $0xc] sm:$0xf0]  ;;  %v3446_v26 = vor.u32 %v4573_v15, %v3445_v14  ;;  %1358 = vmatpush.bf16.msra.mxu1 %v3190_v21  ;;  %v3255_v13 = vld [vmem:[#allocation5 + $0x1b0] sm:$0xf0]  ;;  %v3130_v15 = vor.u32 %v4491_v7, %v3127_v8 }
  0x39   :  { %v3173_v19 = vld [vmem:[#allocation5 + $0x100] sm:$0xf]  ;;  %v4505_v20 = vld [vmem:[#allocation5 + $0x10c] sm:$0xf0]  ;;  %v3046_v33 = vor.u32 %v4473_v18, %v3045_v16  ;;  %1371 = vmatpush.bf16.msra.mxu2 %v3318_v22  ;;  %v3111_v21 = vld [vmem:[#allocation5 + $0x90] sm:$0xf0] }
  0x3a   :  { %v3301_v23 = vld [vmem:[#allocation5 + $0x200] sm:$0xf]  ;;  %v4537_v24 = vld [vmem:[#allocation5 + $0x20c] sm:$0xf0]  ;;  %v3174_v38 = vor.u32 %v4505_v20, %v3173_v19  ;;  %1384 = vmatpush.bf16.msra.mxu3 %v3446_v26  ;;  %v4487_v20 = vld [vmem:[#allocation5 + $0x84] sm:$0xf] }
  0x3b   :  { %v117_v25 = vld [vmem:[#allocation2 + $0x8] sm:$0xff]  ;;  %v3429_v27 = vld [vmem:[#allocation5 + $0x300] sm:$0xf]  ;;  %v3302_v39 = vor.u32 %v4537_v24, %v3301_v23  ;;  %1346 = vmatpush.bf16.msra.mxu0 %v3046_v33  ;;  %v119_v22 = vld [vmem:[#allocation2 + $0x18] sm:$0xf]  ;;  %v3258_v23 = vor.u32 %v4523_v12, %v3255_v13 }
  0x3c   :  { %v4569_v28 = vld [vmem:[#allocation5 + $0x30c] sm:$0xf0]  ;;  %v3669_v29 = vld [vmem:[#allocation5 + $0x4e0] sm:$0xf]  ;;  %v337_v36 = vunpack.c.l.b16 %v117_v25  ;;  %v338_v42 = vunpack.c.h.b16 %v117_v25  ;;  %1359 = vmatpush.bf16.msra.mxu1 %v3174_v38  ;;  %v4519_v25 = vld [vmem:[#allocation5 + $0x184] sm:$0xf]  ;;  %v341_v35 = vunpack.c.l.b16 %v119_v22 }
  0x3d   :  { %v4629_v30 = vld [vmem:[#allocation5 + $0x4ec] sm:$0xf0]  ;;  %v3797_v31 = vld [vmem:[#allocation5 + $0x5e0] sm:$0xf]  ;;  %v3430_v43 = vor.u32 %v4569_v28, %v3429_v27  ;;  %1372 = vmatpush.bf16.msra.mxu2 %v3302_v39  ;;  %v3239_v26 = vld [vmem:[#allocation5 + $0x190] sm:$0xf0]  ;;  %v3114_v28 = vor.u32 %v4487_v20, %v3111_v21 }
  0x3e   :  { %v4661_v32 = vld [vmem:[#allocation5 + $0x5ec] sm:$0xf0]  ;;  %v3813_v40 = vld [vmem:[#allocation5 + $0x600] sm:$0xf]  ;;  %v3670_v44 = vor.u32 %v4629_v30, %v3669_v29  ;;  %v5085_v53 = vpack.c.b16 %v337_v36, %v337_v36  ;;  %v5089_v60 = vpack.c.b16 %v338_v42, %v338_v42  ;;  %1347 = vmatmul.bf16.vlgmr.msra.gmra.mxu0 %v5087_v57  ;;  %v4483_v33 = vld [vmem:[#allocation5 + $0x64] sm:$0xf]  ;;  %v3242_v36 = vor.u32 %v4519_v25, %v3239_v26 }
  0x3f   :  { %v4665_v45 = vld [vmem:[#allocation5 + $0x60c] sm:$0xf0]  ;;  %v3798_v48 = vor.u32 %v4661_v32, %v3797_v31  ;;  %v3653_v50 = vld [vmem:[#allocation5 + $0x4c0] sm:$0xf]  ;;  %1385 = vmatpush.bf16.msra.mxu3 %v3430_v43  ;;  %1360 = vmatmul.bf16.vlgmr.msra.gmra.mxu1 %v5093_v9  ;;  %v4515_v38 = vld [vmem:[#allocation5 + $0x164] sm:$0xf]  ;;  %v3098_v41 = vor.u32 %v4483_v33, %v3095_v34 }
  0x40   :  { %v4625_v51 = vld [vmem:[#allocation5 + $0x4cc] sm:$0xf0]  ;;  %v3781_v52 = vld [vmem:[#allocation5 + $0x5c0] sm:$0xf]  ;;  %v3814_v59 = vor.u32 %v4665_v45, %v3813_v40  ;;  %1391 = vmatpush.bf16.msrb.mxu0 %v3670_v44  ;;  %1373 = vmatmul.bf16.vlgmr.msra.gmra.mxu2 %v5085_v53  ;;  %v3223_v39 = vld [vmem:[#allocation5 + $0x170] sm:$0xf0] }
  0x41   :  { %v4657_v54 = vld [vmem:[#allocation5 + $0x5cc] sm:$0xf0]  ;;  %v3654_v62 = vor.u32 %v4625_v51, %v3653_v50  ;;  %1404 = vmatpush.bf16.msrb.mxu1 %v3798_v48  ;;  %v3637_v3 = vld [vmem:[#allocation5 + $0x4a0] sm:$0xf]  ;;  %v3079_v47 = vld [vmem:[#allocation5 + $0x50] sm:$0xf0]  ;;  %v5097_v48 = vpack.c.b16 %v341_v35, %v341_v35 }
  0x42   :  { %v3782_v1 = vor.u32 %v4657_v54, %v3781_v52  ;;  %v4621_v4 = vld [vmem:[#allocation5 + $0x4ac] sm:$0xf0]  ;;  %v3765_v5 = vld [vmem:[#allocation5 + $0x5a0] sm:$0xf]  ;;  %1424 = vmatpush.bf16.msrb.mxu2 %v3814_v59  ;;  %1386 = vmatmul.bf16.vlgmr.msra.gmra.mxu3 %v5089_v60  ;;  %v4511_v51 = vld [vmem:[#allocation5 + $0x144] sm:$0xf]  ;;  %v3082_v55 = vor.u32 %v4479_v46, %v3079_v47 }
  0x43   :  { %1430 = vmatpush.bf16.msrb.mxu3 %v3162_v49  ;;  %v4653_v6 = vld [vmem:[#allocation5 + $0x5ac] sm:$0xf0]  ;;  %v3638_v11 = vor.u32 %v4621_v4, %v3637_v3  ;;  %v3621_v16 = vld [vmem:[#allocation5 + $0x480] sm:$0xf]  ;;  %v3226_v49 = vor.u32 %v4515_v38, %v3223_v39  ;;  %v3207_v52 = vld [vmem:[#allocation5 + $0x150] sm:$0xf0] }
  0x44   :  { %1392 = vmatpush.bf16.msrb.mxu0 %v3654_v62  ;;  %v3766_v14 = vor.u32 %v4653_v6, %v3765_v5  ;;  %v4617_v17 = vld [vmem:[#allocation5 + $0x48c] sm:$0xf0]  ;;  %v3749_v18 = vld [vmem:[#allocation5 + $0x580] sm:$0xf]  ;;  %v4475_v62 = vld [vmem:[#allocation5 + $0x24] sm:$0xf] }
  0x45   :  { %1405 = vmatpush.bf16.msrb.mxu1 %v3782_v1  ;;  %v4649_v19 = vld [vmem:[#allocation5 + $0x58c] sm:$0xf0]  ;;  %v3622_v24 = vor.u32 %v4617_v17, %v3621_v16  ;;  %v3605_v29 = vld [vmem:[#allocation5 + $0x460] sm:$0xf]  ;;  %v3063_v63 = vld [vmem:[#allocation5 + $0x30] sm:$0xf0]  ;;  %v3210_v1 = vor.u32 %v4511_v51, %v3207_v52 }
  0x46   :  { %1443 = vmatpush.bf16.msra.mxu2 %v3290_v61  ;;  %v3750_v27 = vor.u32 %v4649_v19, %v3749_v18  ;;  %v4613_v30 = vld [vmem:[#allocation5 + $0x46c] sm:$0xf0]  ;;  %v3733_v31 = vld [vmem:[#allocation5 + $0x560] sm:$0xf]  ;;  %v4507_v0 = vld [vmem:[#allocation5 + $0x124] sm:$0xf]  ;;  %v3066_v7 = vor.u32 %v4475_v62, %v3063_v63 }
  0x47   :  { %1431 = vmatpush.bf16.msrb.mxu3 %v3146_v2  ;;  %v4645_v32 = vld [vmem:[#allocation5 + $0x56c] sm:$0xf0]  ;;  %v3606_v37 = vor.u32 %v4613_v30, %v3605_v29  ;;  %v3589_v42 = vld [vmem:[#allocation5 + $0x440] sm:$0xf]  ;;  %v3191_v3 = vld [vmem:[#allocation5 + $0x130] sm:$0xf0] }
  0x48   :  { %1393 = vmatpush.bf16.msrb.mxu0 %v3638_v11  ;;  %v3734_v40 = vor.u32 %v4645_v32, %v3733_v31  ;;  %v4609_v43 = vld [vmem:[#allocation5 + $0x44c] sm:$0xf0]  ;;  %v3717_v44 = vld [vmem:[#allocation5 + $0x540] sm:$0xf]  ;;  %v118_v5 = vld [vmem:[#allocation2 + $0x10] sm:$0xff]  ;;  %v3194_v19 = vor.u32 %v4507_v0, %v3191_v3 }
  0x49   :  { %1406 = vmatpush.bf16.msrb.mxu1 %v3766_v14  ;;  %v4641_v45 = vld [vmem:[#allocation5 + $0x54c] sm:$0xf0]  ;;  %v3590_v50 = vor.u32 %v4609_v43, %v3589_v42  ;;  %v3573_v56 = vld [vmem:[#allocation5 + $0x420] sm:$0xf]  ;;  %v4471_v12 = vld [vmem:[#allocation5 + $0x4] sm:$0xf]  ;;  %v339_v18 = vunpack.c.l.b16 %v118_v5 }
  0x4a   :  { %1444 = vmatpush.bf16.msra.mxu2 %v3274_v10  ;;  %v3718_v54 = vor.u32 %v4641_v45, %v3717_v44  ;;  %v4605_v58 = vld [vmem:[#allocation5 + $0x42c] sm:$0xf0]  ;;  %v3701_v59 = vld [vmem:[#allocation5 + $0x520] sm:$0xf]  ;;  %v3047_v13 = vld [vmem:[#allocation5 + $0x10] sm:$0xf0] }
  0x4b   :  { %1432 = vmatpush.bf16.msrb.mxu3 %v3130_v15  ;;  %v4637_v61 = vld [vmem:[#allocation5 + $0x52c] sm:$0xf0]  ;;  %v3574_v2 = vor.u32 %v4605_v58, %v3573_v56  ;;  %v3557_v4 = vld [vmem:[#allocation5 + $0x400] sm:$0xf]  ;;  %v4563_v14 = vld [vmem:[#allocation5 + $0x2e4] sm:$0xf]  ;;  %v3050_v25 = vor.u32 %v4471_v12, %v3047_v13  ;;  %v5101_v34 = vpack.c.b16 %v339_v18, %v339_v18 }
  0x4c   :  { %1394 = vmatpush.bf16.msrb.mxu0 %v3622_v24  ;;  %v3702_v6 = vor.u32 %v4637_v61, %v3701_v59  ;;  %v4601_v8 = vld [vmem:[#allocation5 + $0x40c] sm:$0xf0]  ;;  %v3685_v10 = vld [vmem:[#allocation5 + $0x500] sm:$0xf]  ;;  %v3415_v15 = vld [vmem:[#allocation5 + $0x2f0] sm:$0xf0] }
  0x4d   :  { %1407 = vmatpush.bf16.msrb.mxu1 %v3750_v27  ;;  %v4633_v11 = vld [vmem:[#allocation5 + $0x50c] sm:$0xf0]  ;;  %v4595_v16 = vld [vmem:[#allocation5 + $0x3e4] sm:$0xf]  ;;  %v3543_v17 = vld [vmem:[#allocation5 + $0x3f0] sm:$0xf0]  ;;  %v3558_v20 = vor.u32 %v4601_v8, %v3557_v4 }
  0x4e   :  { %1445 = vmatpush.bf16.msra.mxu2 %v3258_v23  ;;  %v4627_v21 = vld [vmem:[#allocation5 + $0x4e4] sm:$0xf]  ;;  %v3671_v22 = vld [vmem:[#allocation5 + $0x4f0] sm:$0xf0]  ;;  %v340_v23 = vunpack.c.h.b16 %v118_v5  ;;  %v3686_v24 = vor.u32 %v4633_v11, %v3685_v10  ;;  %v3546_v29 = vor.u32 %v4595_v16, %v3543_v17 }
  0x4f   :  { %1433 = vmatpush.bf16.msrb.mxu3 %v3114_v28  ;;  %v4503_v26 = vld [vmem:[#allocation5 + $0x104] sm:$0xf]  ;;  %v3175_v27 = vld [vmem:[#allocation5 + $0x110] sm:$0xf0]  ;;  %v3418_v28 = vor.u32 %v4563_v14, %v3415_v15  ;;  %v3674_v33 = vor.u32 %v4627_v21, %v3671_v22 }
  0x50   :  { %1395 = vmatpush.bf16.msrb.mxu0 %v3606_v37  ;;  %3827 = vmatmul.msk.bf16.vlgmr.msrb.gmra.mxu2 %vm1335_vm0, %v5097_v48  ;;  %v4659_v30 = vld [vmem:[#allocation5 + $0x5e4] sm:$0xf]  ;;  %v3799_v31 = vld [vmem:[#allocation5 + $0x5f0] sm:$0xf0]  ;;  %v3178_v38 = vor.u32 %v4503_v26, %v3175_v27  ;;  %v5103_v39 = vpack.c.b16 %v340_v23, %v340_v23 }
  0x51   :  { %1408 = vmatpush.bf16.msrb.mxu1 %v3734_v40  ;;  %v4559_v32 = vld [vmem:[#allocation5 + $0x2c4] sm:$0xf]  ;;  %v3399_v35 = vld [vmem:[#allocation5 + $0x2d0] sm:$0xf0]  ;;  %v3802_v42 = vor.u32 %v4659_v30, %v3799_v31 }
  0x52   :  { %1446 = vmatpush.bf16.msra.mxu2 %v3242_v36  ;;  %v4591_v36 = vld [vmem:[#allocation5 + $0x3c4] sm:$0xf]  ;;  %v3527_v37 = vld [vmem:[#allocation5 + $0x3d0] sm:$0xf0]  ;;  %v3402_v43 = vor.u32 %v4559_v32, %v3399_v35 }
  0x53   :  { %1434 = vmatpush.bf16.msrb.mxu3 %v3098_v41  ;;  %v4623_v40 = vld [vmem:[#allocation5 + $0x4c4] sm:$0xf]  ;;  %v3655_v41 = vld [vmem:[#allocation5 + $0x4d0] sm:$0xf0]  ;;  %v3530_v44 = vor.u32 %v4591_v36, %v3527_v37 }
  0x54   :  { %1396 = vmatpush.bf16.msrb.mxu0 %v3590_v50  ;;  %v4655_v45 = vld [vmem:[#allocation5 + $0x5c4] sm:$0xf]  ;;  %v3783_v46 = vld [vmem:[#allocation5 + $0x5d0] sm:$0xf0] }
  0x55   :  { %1409 = vmatpush.bf16.msrb.mxu1 %v3718_v54  ;;  %v4555_v47 = vld [vmem:[#allocation5 + $0x2a4] sm:$0xf]  ;;  %v3383_v50 = vld [vmem:[#allocation5 + $0x2b0] sm:$0xf0]  ;;  %v3786_v56 = vor.u32 %v4655_v45, %v3783_v46 }
  0x56   :  { %1447 = vmatpush.bf16.msra.mxu2 %v3226_v49  ;;  %v3658_v49 = vor.u32 %v4623_v40, %v3655_v41  ;;  %v4587_v51 = vld [vmem:[#allocation5 + $0x3a4] sm:$0xf]  ;;  %v3511_v52 = vld [vmem:[#allocation5 + $0x3b0] sm:$0xf0]  ;;  %v3386_v58 = vor.u32 %v4555_v47, %v3383_v50 }
  0x57   :  { %1435 = vmatpush.bf16.msrb.mxu3 %v3082_v55  ;;  %v4619_v54 = vld [vmem:[#allocation5 + $0x4a4] sm:$0xf]  ;;  %v3639_v55 = vld [vmem:[#allocation5 + $0x4b0] sm:$0xf0]  ;;  %v3514_v59 = vor.u32 %v4587_v51, %v3511_v52 }
  0x58   :  { %1397 = vmatpush.bf16.msrb.mxu0 %v3574_v2  ;;  %v4651_v61 = vld [vmem:[#allocation5 + $0x5a4] sm:$0xf]  ;;  %v3767_v62 = vld [vmem:[#allocation5 + $0x5b0] sm:$0xf0]  ;;  %v3642_v0 = vor.u32 %v4619_v54, %v3639_v55 }
  0x59   :  { %1410 = vmatpush.bf16.msrb.mxu1 %v3702_v6  ;;  %v4551_v63 = vld [vmem:[#allocation5 + $0x284] sm:$0xf]  ;;  %v3495_v3 = vld [vmem:[#allocation5 + $0x390] sm:$0xf0]  ;;  %v3770_v6 = vor.u32 %v4651_v61, %v3767_v62  ;;  %v3165_v61 = vld [vmem:[#allocation5 + $0xe8] sm:$0xf] }
  0x5a   :  { %1448 = vmatpush.bf16.msra.mxu2 %v3210_v1  ;;  %v3367_v1 = vld [vmem:[#allocation5 + $0x290] sm:$0xf0]  ;;  %v4583_v2 = vld [vmem:[#allocation5 + $0x384] sm:$0xf]  ;;  %v4502_v62 = vld [vmem:[#allocation5 + $0xf4] sm:$0xf0] }
  0x5b   :  { %1436 = vmatpush.bf16.msrb.mxu3 %v3066_v7  ;;  %v4615_v4 = vld [vmem:[#allocation5 + $0x484] sm:$0xf]  ;;  %v3623_v5 = vld [vmem:[#allocation5 + $0x490] sm:$0xf0]  ;;  %v3370_v7 = vor.u32 %v4551_v63, %v3367_v1  ;;  %v3498_v8 = vor.u32 %v4583_v2, %v3495_v3  ;;  %v3421_v2 = vld [vmem:[#allocation5 + $0x2e8] sm:$0xf] }
  0x5c   :  { %1398 = vmatpush.bf16.msrb.mxu0 %v3558_v20  ;;  %v4647_v10 = vld [vmem:[#allocation5 + $0x584] sm:$0xf]  ;;  %v3751_v11 = vld [vmem:[#allocation5 + $0x590] sm:$0xf0]  ;;  %v3626_v13 = vor.u32 %v4615_v4, %v3623_v5  ;;  %v4566_v3 = vld [vmem:[#allocation5 + $0x2f4] sm:$0xf0] }
  0x5d   :  { %1411 = vmatpush.bf16.msrb.mxu1 %v3686_v24  ;;  %v4547_v12 = vld [vmem:[#allocation5 + $0x264] sm:$0xf]  ;;  %v3351_v14 = vld [vmem:[#allocation5 + $0x270] sm:$0xf0] }
  0x5e   :  { %1449 = vmatpush.bf16.msra.mxu2 %v3194_v19  ;;  %v4579_v15 = vld [vmem:[#allocation5 + $0x364] sm:$0xf]  ;;  %v3479_v16 = vld [vmem:[#allocation5 + $0x370] sm:$0xf0]  ;;  %v3754_v19 = vor.u32 %v4647_v10, %v3751_v11  ;;  %v3354_v20 = vor.u32 %v4547_v12, %v3351_v14  ;;  %v3166_v10 = vor.u32 %v4502_v62, %v3165_v61  ;;  %v3549_v11 = vld [vmem:[#allocation5 + $0x3e8] sm:$0xf] }
  0x5f   :  { %1437 = vmatpush.bf16.msrb.mxu3 %v3050_v25  ;;  %1399 = vmatmul.bf16.vlgmr.msrb.gmra.mxu0 %v5101_v34  ;;  %v4611_v17 = vld [vmem:[#allocation5 + $0x464] sm:$0xf]  ;;  %v3607_v18 = vld [vmem:[#allocation5 + $0x470] sm:$0xf0]  ;;  %v3482_v21 = vor.u32 %v4579_v15, %v3479_v16  ;;  %v4598_v12 = vld [vmem:[#allocation5 + $0x3f4] sm:$0xf0]  ;;  %v3422_v16 = vor.u32 %v4566_v3, %v3421_v2 }
  0x60   :  { %1456 = vmatpush.bf16.msra.mxu0 %v3418_v28  ;;  %1412 = vmatmul.bf16.vlgmr.msrb.gmra.mxu1 %v5103_v39  ;;  %v4643_v22 = vld [vmem:[#allocation5 + $0x564] sm:$0xf]  ;;  %v3735_v23 = vld [vmem:[#allocation5 + $0x570] sm:$0xf0]  ;;  %v3610_v25 = vor.u32 %v4611_v17, %v3607_v18  ;;  %v3293_v14 = vld [vmem:[#allocation5 + $0x1e8] sm:$0xf] }
  0x61   :  { %1469 = vmatpush.bf16.msra.mxu1 %v3546_v29  ;;  %v4543_v24 = vld [vmem:[#allocation5 + $0x244] sm:$0xf]  ;;  %v3335_v26 = vld [vmem:[#allocation5 + $0x250] sm:$0xf0]  ;;  %v3738_v31 = vor.u32 %v4643_v22, %v3735_v23  ;;  %v4534_v15 = vld [vmem:[#allocation5 + $0x1f4] sm:$0xf0] }
  0x62   :  { %1450 = vmatpush.bf16.msra.mxu2 %v3178_v38  ;;  %1438 = vmatmul.bf16.vlgmr.msrb.gmra.mxu3 %v5087_v57  ;;  %v4575_v27 = vld [vmem:[#allocation5 + $0x344] sm:$0xf]  ;;  %v3463_v28 = vld [vmem:[#allocation5 + $0x350] sm:$0xf0]  ;;  %v3338_v32 = vor.u32 %v4543_v24, %v3335_v26  ;;  %v3149_v18 = vld [vmem:[#allocation5 + $0xc8] sm:$0xf]  ;;  %v3294_v23 = vor.u32 %v4534_v15, %v3293_v14 }
  0x63   :  { %1482 = vmatpush.bf16.msra.mxu3 %v3674_v33  ;;  %v4607_v29 = vld [vmem:[#allocation5 + $0x444] sm:$0xf]  ;;  %v3591_v30 = vld [vmem:[#allocation5 + $0x450] sm:$0xf0]  ;;  %v3466_v33 = vor.u32 %v4575_v27, %v3463_v28  ;;  %v4562_v22 = vld [vmem:[#allocation5 + $0x2d4] sm:$0xf0] }
  0x64   :  { %1457 = vmatpush.bf16.msra.mxu0 %v3402_v43  ;;  %v4639_v35 = vld [vmem:[#allocation5 + $0x544] sm:$0xf]  ;;  %v3719_v36 = vld [vmem:[#allocation5 + $0x550] sm:$0xf0]  ;;  %v3594_v38 = vor.u32 %v4607_v29, %v3591_v30  ;;  %v3533_v24 = vld [vmem:[#allocation5 + $0x3c8] sm:$0xf] }
  0x65   :  { %1470 = vmatpush.bf16.msra.mxu1 %v3530_v44  ;;  %1451 = vmatmul.bf16.vlgmr.msra.gmra.mxu2 %v5093_v9  ;;  %v4539_v37 = vld [vmem:[#allocation5 + $0x224] sm:$0xf]  ;;  %v3319_v40 = vld [vmem:[#allocation5 + $0x230] sm:$0xf0]  ;;  %v3722_v45 = vor.u32 %v4639_v35, %v3719_v36  ;;  %v3277_v27 = vld [vmem:[#allocation5 + $0x1c8] sm:$0xf] }
  0x66   :  { %1495 = vmatpush.bf16.msrb.mxu2 %v3802_v42  ;;  %v4571_v41 = vld [vmem:[#allocation5 + $0x324] sm:$0xf]  ;;  %v3447_v42 = vld [vmem:[#allocation5 + $0x330] sm:$0xf0]  ;;  %v4530_v28 = vld [vmem:[#allocation5 + $0x1d4] sm:$0xf0] }
  0x67   :  { %1483 = vmatpush.bf16.msra.mxu3 %v3658_v49  ;;  %v4603_v43 = vld [vmem:[#allocation5 + $0x424] sm:$0xf]  ;;  %v3575_v44 = vld [vmem:[#allocation5 + $0x430] sm:$0xf0]  ;;  %v3322_v49 = vor.u32 %v4539_v37, %v3319_v40  ;;  %v3450_v50 = vor.u32 %v4571_v41, %v3447_v42  ;;  %v3133_v30 = vld [vmem:[#allocation5 + $0xa8] sm:$0xf]  ;;  %v3278_v36 = vor.u32 %v4530_v28, %v3277_v27 }
  0x68   :  { %1458 = vmatpush.bf16.msra.mxu0 %v3386_v58  ;;  %v4635_v46 = vld [vmem:[#allocation5 + $0x524] sm:$0xf]  ;;  %v3703_v47 = vld [vmem:[#allocation5 + $0x530] sm:$0xf0]  ;;  %v3578_v55 = vor.u32 %v4603_v43, %v3575_v44  ;;  %v4558_v35 = vld [vmem:[#allocation5 + $0x2b4] sm:$0xf0] }
  0x69   :  { %1471 = vmatpush.bf16.msra.mxu1 %v3514_v59  ;;  %v4535_v51 = vld [vmem:[#allocation5 + $0x204] sm:$0xf]  ;;  %v3303_v52 = vld [vmem:[#allocation5 + $0x210] sm:$0xf0]  ;;  %v3517_v37 = vld [vmem:[#allocation5 + $0x3a8] sm:$0xf] }
  0x6a   :  { %1496 = vmatpush.bf16.msrb.mxu2 %v3786_v56  ;;  %v4567_v54 = vld [vmem:[#allocation5 + $0x304] sm:$0xf]  ;;  %v3431_v56 = vld [vmem:[#allocation5 + $0x310] sm:$0xf0]  ;;  %v3306_v4 = vor.u32 %v4535_v51, %v3303_v52  ;;  %v3261_v41 = vld [vmem:[#allocation5 + $0x1a8] sm:$0xf] }
  0x6b   :  { %1484 = vmatpush.bf16.msra.mxu3 %v3642_v0  ;;  %v4599_v58 = vld [vmem:[#allocation5 + $0x404] sm:$0xf]  ;;  %v3559_v59 = vld [vmem:[#allocation5 + $0x410] sm:$0xf0]  ;;  %v3706_v0 = vor.u32 %v4635_v46, %v3703_v47  ;;  %v3434_v5 = vor.u32 %v4567_v54, %v3431_v56  ;;  %v4526_v42 = vld [vmem:[#allocation5 + $0x1b4] sm:$0xf0] }
  0x6c   :  { %1459 = vmatpush.bf16.msra.mxu0 %v3370_v7  ;;  %v4663_v63 = vld [vmem:[#allocation5 + $0x604] sm:$0xf]  ;;  %v3815_v1 = vld [vmem:[#allocation5 + $0x610] sm:$0xf0]  ;;  %v3117_v44 = vld [vmem:[#allocation5 + $0x88] sm:$0xf] }
  0x6d   :  { %1472 = vmatpush.bf16.msra.mxu1 %v3498_v8  ;;  %v3687_v7 = vld [vmem:[#allocation5 + $0x510] sm:$0xf0]  ;;  %v3562_v8 = vor.u32 %v4599_v58, %v3559_v59  ;;  %v3373_v47 = vld [vmem:[#allocation5 + $0x288] sm:$0xf]  ;;  %v4586_v52 = vld [vmem:[#allocation5 + $0x394] sm:$0xf0] }
  0x6e   :  { %1497 = vmatpush.bf16.msrb.mxu2 %v3770_v6  ;;  %v4631_v6 = vld [vmem:[#allocation5 + $0x504] sm:$0xf]  ;;  %v3501_v51 = vld [vmem:[#allocation5 + $0x388] sm:$0xf]  ;;  %v4522_v56 = vld [vmem:[#allocation5 + $0x194] sm:$0xf0] }
  0x6f   :  { %1485 = vmatpush.bf16.msra.mxu3 %v3626_v13  ;;  %v3818_v13 = vor.u32 %v4663_v63, %v3815_v1  ;;  %v3690_v17 = vor.u32 %v4631_v6, %v3687_v7  ;;  %v3101_v59 = vld [vmem:[#allocation5 + $0x68] sm:$0xf]  ;;  %v4486_v61 = vld [vmem:[#allocation5 + $0x74] sm:$0xf0]  ;;  %v3502_v62 = vor.u32 %v4586_v52, %v3501_v51  ;;  %v4500_v51 = vld [vmem:[#allocation5 + $0xec] sm:$0xf] }
  0x70   :  { %1460 = vmatpush.bf16.msra.mxu0 %v3354_v20  ;;  %v3550_v20 = vor.u32 %v4598_v12, %v3549_v11  ;;  %v3357_v63 = vld [vmem:[#allocation5 + $0x268] sm:$0xf]  ;;  %v4582_v3 = vld [vmem:[#allocation5 + $0x374] sm:$0xf0]  ;;  %v3167_v52 = vld [vmem:[#allocation5 + $0xf8] sm:$0xf0] }
  0x71   :  { %1473 = vmatpush.bf16.msra.mxu1 %v3482_v21  ;;  %v3405_v21 = vld [vmem:[#allocation5 + $0x2c8] sm:$0xf]  ;;  %v4518_v6 = vld [vmem:[#allocation5 + $0x174] sm:$0xf0] }
  0x72   :  { %1498 = vmatpush.bf16.msrb.mxu2 %v3754_v19  ;;  %v4498_v19 = vld [vmem:[#allocation5 + $0xd4] sm:$0xf0]  ;;  %v3406_v29 = vor.u32 %v4562_v22, %v3405_v21  ;;  %v3485_v2 = vld [vmem:[#allocation5 + $0x368] sm:$0xf] }
  0x73   :  { %1486 = vmatpush.bf16.msra.mxu3 %v3610_v25  ;;  %v4594_v25 = vld [vmem:[#allocation5 + $0x3d4] sm:$0xf0]  ;;  %v3150_v26 = vor.u32 %v4498_v19, %v3149_v18  ;;  %v3486_v11 = vor.u32 %v4582_v3, %v3485_v2  ;;  %v3341_v12 = vld [vmem:[#allocation5 + $0x248] sm:$0xf]  ;;  %v3170_v3 = vor.u32 %v4500_v51, %v3167_v52 }
  0x74   :  { %1461 = vmatpush.bf16.msra.mxu0 %v3338_v32  ;;  %v3534_v32 = vor.u32 %v4594_v25, %v3533_v24  ;;  %v3469_v15 = vld [vmem:[#allocation5 + $0x348] sm:$0xf]  ;;  %v4514_v19 = vld [vmem:[#allocation5 + $0x154] sm:$0xf0] }
  0x75   :  { %1474 = vmatpush.bf16.msra.mxu1 %v3466_v33  ;;  %v3389_v33 = vld [vmem:[#allocation5 + $0x2a8] sm:$0xf]  ;;  %v4478_v22 = vld [vmem:[#allocation5 + $0x34] sm:$0xf0] }
  0x76   :  { %1499 = vmatpush.bf16.msrb.mxu2 %v3738_v31  ;;  %v4494_v31 = vld [vmem:[#allocation5 + $0xb4] sm:$0xf0]  ;;  %v3390_v43 = vor.u32 %v4558_v35, %v3389_v33  ;;  %v3213_v18 = vld [vmem:[#allocation5 + $0x148] sm:$0xf] }
  0x77   :  { %1487 = vmatpush.bf16.msra.mxu3 %v3594_v38  ;;  %v4590_v38 = vld [vmem:[#allocation5 + $0x3b4] sm:$0xf0]  ;;  %v3134_v40 = vor.u32 %v4494_v31, %v3133_v30  ;;  %v3069_v21 = vld [vmem:[#allocation5 + $0x28] sm:$0xf] }
  0x78   :  { %1462 = vmatpush.bf16.msra.mxu0 %v3322_v49  ;;  %v3518_v46 = vor.u32 %v4590_v38, %v3517_v37  ;;  %v4554_v49 = vld [vmem:[#allocation5 + $0x294] sm:$0xf0]  ;;  %v3325_v24 = vld [vmem:[#allocation5 + $0x228] sm:$0xf] }
  0x79   :  { %1475 = vmatpush.bf16.msra.mxu1 %v3450_v50  ;;  %v3262_v50 = vor.u32 %v4526_v42, %v3261_v41  ;;  %v3374_v58 = vor.u32 %v4554_v49, %v3373_v47  ;;  %v4542_v25 = vld [vmem:[#allocation5 + $0x234] sm:$0xf0]  ;;  %v3453_v27 = vld [vmem:[#allocation5 + $0x328] sm:$0xf] }
  0x7a   :  { %1500 = vmatpush.bf16.msrb.mxu2 %v3722_v45  ;;  %v4490_v45 = vld [vmem:[#allocation5 + $0x94] sm:$0xf0]  ;;  %v3197_v30 = vld [vmem:[#allocation5 + $0x128] sm:$0xf]  ;;  %v3326_v33 = vor.u32 %v4542_v25, %v3325_v24 }
  0x7b   :  { %1488 = vmatpush.bf16.msra.mxu3 %v3578_v55  ;;  %v3118_v54 = vor.u32 %v4490_v45, %v3117_v44  ;;  %v3245_v55 = vld [vmem:[#allocation5 + $0x188] sm:$0xf]  ;;  %v4574_v28 = vld [vmem:[#allocation5 + $0x334] sm:$0xf0] }
  0x7c   :  { %1463 = vmatpush.bf16.msra.mxu0 %v3306_v4  ;;  %v3246_v1 = vor.u32 %v4522_v56, %v3245_v55  ;;  %v3102_v4 = vor.u32 %v4486_v61, %v3101_v59  ;;  %v4510_v31 = vld [vmem:[#allocation5 + $0x134] sm:$0xf0]  ;;  %v3454_v38 = vor.u32 %v4574_v28, %v3453_v27  ;;  %v3309_v41 = vld [vmem:[#allocation5 + $0x208] sm:$0xf]  ;;  %v3263_v27 = vld [vmem:[#allocation5 + $0x1b8] sm:$0xf0] }
  0x7d   :  { %1476 = vmatpush.bf16.msra.mxu1 %v3434_v5  ;;  %v3229_v5 = vld [vmem:[#allocation5 + $0x168] sm:$0xf]  ;;  %v4474_v35 = vld [vmem:[#allocation5 + $0x14] sm:$0xf0]  ;;  %v3198_v44 = vor.u32 %v4510_v31, %v3197_v30  ;;  %v4488_v30 = vld [vmem:[#allocation5 + $0x8c] sm:$0xf] }
  0x7e   :  { %1501 = vmatpush.bf16.msrb.mxu2 %v3706_v0  ;;  %v4550_v0 = vld [vmem:[#allocation5 + $0x274] sm:$0xf0]  ;;  %v3230_v14 = vor.u32 %v4518_v6, %v3229_v5  ;;  %v3805_v56 = vld [vmem:[#allocation5 + $0x5e8] sm:$0xf]  ;;  %v4496_v5 = vld [vmem:[#allocation5 + $0xcc] sm:$0xf] }
  0x7f   :  { %1489 = vmatpush.bf16.msra.mxu3 %v3562_v8  ;;  %1464 = vmatmul.bf16.vlgmr.msra.gmra.mxu0 %v5085_v53  ;;  %v3358_v7 = vor.u32 %v4550_v0, %v3357_v63  ;;  %v3085_v8 = vld [vmem:[#allocation5 + $0x48] sm:$0xf]  ;;  %v4630_v37 = vld [vmem:[#allocation5 + $0x4f4] sm:$0xf0]  ;;  %v4532_v0 = vld [vmem:[#allocation5 + $0x1ec] sm:$0xf] }
  0x80   :  { %1547 = vmatpush.bf16.msrb.mxu0 %v3422_v16  ;;  %1477 = vmatmul.bf16.vlgmr.msra.gmra.mxu1 %v5089_v60  ;;  %v4578_v16 = vld [vmem:[#allocation5 + $0x354] sm:$0xf0]  ;;  %v3661_v59 = vld [vmem:[#allocation5 + $0x4c8] sm:$0xf]  ;;  %v3151_v6 = vld [vmem:[#allocation5 + $0xd8] sm:$0xf0] }
  0x81   :  { %1521 = vmatpush.bf16.msrb.mxu1 %v3166_v10  ;;  %v4482_v10 = vld [vmem:[#allocation5 + $0x54] sm:$0xf0]  ;;  %v3629_v24 = vld [vmem:[#allocation5 + $0x488] sm:$0xf]  ;;  %v3119_v31 = vld [vmem:[#allocation5 + $0x98] sm:$0xf0] }
  0x82   :  { %1502 = vmatpush.bf16.msrb.mxu2 %v3690_v17  ;;  %1490 = vmatmul.bf16.vlgmr.msra.gmra.mxu3 %v5101_v34  ;;  %v3086_v17 = vor.u32 %v4482_v10, %v3085_v8  ;;  %v4538_v42 = vld [vmem:[#allocation5 + $0x214] sm:$0xf0]  ;;  %v3789_v10 = vld [vmem:[#allocation5 + $0x5c8] sm:$0xf] }
  0x83   :  { %1515 = vmatpush.bf16.msrb.mxu3 %v3818_v13  ;;  %v4546_v13 = vld [vmem:[#allocation5 + $0x254] sm:$0xf0]  ;;  %v3310_v55 = vor.u32 %v4538_v42, %v3309_v41  ;;  %v3247_v41 = vld [vmem:[#allocation5 + $0x198] sm:$0xf0]  ;;  %v3122_v42 = vor.u32 %v4488_v30, %v3119_v31  ;;  %v3597_v51 = vld [vmem:[#allocation5 + $0x448] sm:$0xf] }
  0x84   :  { %1548 = vmatpush.bf16.msrb.mxu0 %v3406_v29  ;;  %v3070_v29 = vor.u32 %v4478_v22, %v3069_v21  ;;  %v4570_v45 = vld [vmem:[#allocation5 + $0x314] sm:$0xf0]  ;;  %v3773_v22 = vld [vmem:[#allocation5 + $0x5a8] sm:$0xf]  ;;  %v3551_v30 = vld [vmem:[#allocation5 + $0x3f8] sm:$0xf0] }
  0x85   :  { %1522 = vmatpush.bf16.msrb.mxu1 %v3150_v26  ;;  %1503 = vmatmul.bf16.vlgmr.msrb.gmra.mxu2 %v5103_v39  ;;  %v3214_v26 = vor.u32 %v4514_v19, %v3213_v18  ;;  %v4666_v47 = vld [vmem:[#allocation5 + $0x614] sm:$0xf0]  ;;  %v4492_v18 = vld [vmem:[#allocation5 + $0xac] sm:$0xf]  ;;  %v3135_v19 = vld [vmem:[#allocation5 + $0xb8] sm:$0xf0] }
  0x86   :  { %1560 = vmatpush.bf16.msra.mxu2 %v3550_v20  ;;  %v3342_v20 = vor.u32 %v4546_v13, %v3341_v12  ;;  %v3645_v12 = vld [vmem:[#allocation5 + $0x4a8] sm:$0xf]  ;;  %v4622_v13 = vld [vmem:[#allocation5 + $0x4b4] sm:$0xf0]  ;;  %v3138_v28 = vor.u32 %v4492_v18, %v3135_v19  ;;  %v3199_v18 = vld [vmem:[#allocation5 + $0x138] sm:$0xf0] }
  0x87   :  { %1534 = vmatpush.bf16.msra.mxu3 %v3294_v23  ;;  %v3470_v23 = vor.u32 %v4578_v16, %v3469_v15  ;;  %v3279_v15 = vld [vmem:[#allocation5 + $0x1d8] sm:$0xf0]  ;;  %v3154_v16 = vor.u32 %v4496_v5, %v3151_v6  ;;  %v4618_v25 = vld [vmem:[#allocation5 + $0x494] sm:$0xf0] }
  0x88   :  { %1549 = vmatpush.bf16.msrb.mxu0 %v3390_v43  ;;  %v3437_v43 = vld [vmem:[#allocation5 + $0x308] sm:$0xf]  ;;  %v4610_v52 = vld [vmem:[#allocation5 + $0x454] sm:$0xf0]  ;;  %v3215_v5 = vld [vmem:[#allocation5 + $0x158] sm:$0xf0] }
  0x89   :  { %1523 = vmatpush.bf16.msrb.mxu1 %v3134_v40  ;;  %v3181_v40 = vld [vmem:[#allocation5 + $0x108] sm:$0xf]  ;;  %v3438_v61 = vor.u32 %v4570_v45, %v3437_v43  ;;  %v3103_v45 = vld [vmem:[#allocation5 + $0x78] sm:$0xf0] }
  0x8a   :  { %1561 = vmatpush.bf16.msra.mxu2 %v3534_v32  ;;  %v3053_v32 = vld [vmem:[#allocation5 + $0x8] sm:$0xf] }
  0x8b   :  { %1535 = vmatpush.bf16.msra.mxu3 %v3278_v36  ;;  %v3677_v36 = vld [vmem:[#allocation5 + $0x4e8] sm:$0xf]  ;;  %v3054_v49 = vor.u32 %v4474_v35, %v3053_v32  ;;  %v3630_v32 = vor.u32 %v4618_v25, %v3629_v24  ;;  %v4472_v24 = vld [vmem:[#allocation5 + $0xc] sm:$0xf]  ;;  %v3055_v25 = vld [vmem:[#allocation5 + $0x18] sm:$0xf0] }
  0x8c   :  { %1550 = vmatpush.bf16.msrb.mxu0 %v3374_v58  ;;  %v4662_v58 = vld [vmem:[#allocation5 + $0x5f4] sm:$0xf0]  ;;  %v3757_v35 = vld [vmem:[#allocation5 + $0x588] sm:$0xf] }
  0x8d   :  { %1524 = vmatpush.bf16.msrb.mxu1 %v3118_v54  ;;  %v3678_v54 = vor.u32 %v4630_v37, %v3677_v36  ;;  %v4650_v36 = vld [vmem:[#allocation5 + $0x594] sm:$0xf0]  ;;  %v3613_v37 = vld [vmem:[#allocation5 + $0x468] sm:$0xf] }
  0x8e   :  { %1562 = vmatpush.bf16.msra.mxu2 %v3518_v46  ;;  %v3821_v46 = vld [vmem:[#allocation5 + $0x608] sm:$0xf]  ;;  %v3758_v43 = vor.u32 %v4650_v36, %v3757_v35  ;;  %v4560_v35 = vld [vmem:[#allocation5 + $0x2cc] sm:$0xf]  ;;  %v3058_v36 = vor.u32 %v4472_v24, %v3055_v25 }
  0x8f   :  { %1536 = vmatpush.bf16.msra.mxu3 %v3262_v50  ;;  %v4506_v50 = vld [vmem:[#allocation5 + $0x114] sm:$0xf0]  ;;  %v3822_v63 = vor.u32 %v4666_v47, %v3821_v46  ;;  %v4580_v24 = vld [vmem:[#allocation5 + $0x36c] sm:$0xf] }
  0x90   :  { %1551 = vmatpush.bf16.msrb.mxu0 %v3358_v7  ;;  %v3182_v2 = vor.u32 %v4506_v50, %v3181_v40  ;;  %v4520_v40 = vld [vmem:[#allocation5 + $0x18c] sm:$0xf]  ;;  %v4646_v50 = vld [vmem:[#allocation5 + $0x574] sm:$0xf0] }
  0x91   :  { %1525 = vmatpush.bf16.msrb.mxu1 %v3102_v4  ;;  %v3806_v4 = vor.u32 %v4662_v58, %v3805_v56  ;;  %v3250_v47 = vor.u32 %v4520_v40, %v3247_v41  ;;  %v3183_v40 = vld [vmem:[#allocation5 + $0x118] sm:$0xf0] }
  0x92   :  { %1563 = vmatpush.bf16.msra.mxu2 %v3502_v62  ;;  %3828 = vmatmul.msk.bf16.vlgmr.msrb.gmra.mxu3 %vm1335_vm0, %v5097_v48  ;;  %v4626_v62 = vld [vmem:[#allocation5 + $0x4d4] sm:$0xf0] }
  0x93   :  { %1537 = vmatpush.bf16.msra.mxu3 %v3246_v1  ;;  %v3295_v1 = vld [vmem:[#allocation5 + $0x1f8] sm:$0xf0]  ;;  %v3662_v7 = vor.u32 %v4626_v62, %v3661_v59  ;;  %v4480_v59 = vld [vmem:[#allocation5 + $0x4c] sm:$0xf]  ;;  %v3598_v62 = vor.u32 %v4610_v52, %v3597_v51 }
  0x94   :  { %1552 = vmatpush.bf16.msrb.mxu0 %v3342_v20  ;;  %v3298_v8 = vor.u32 %v4532_v0, %v3295_v1  ;;  %v3646_v20 = vor.u32 %v4622_v13, %v3645_v12  ;;  %v3725_v0 = vld [vmem:[#allocation5 + $0x548] sm:$0xf]  ;;  %v4642_v1 = vld [vmem:[#allocation5 + $0x554] sm:$0xf0]  ;;  %v4624_v51 = vld [vmem:[#allocation5 + $0x4cc] sm:$0xf] }
  0x95   :  { %1526 = vmatpush.bf16.msrb.mxu1 %v3086_v17  ;;  %v3709_v13 = vld [vmem:[#allocation5 + $0x528] sm:$0xf]  ;;  %v3663_v52 = vld [vmem:[#allocation5 + $0x4d8] sm:$0xf0] }
  0x96   :  { %1564 = vmatpush.bf16.msra.mxu2 %v3486_v11  ;;  %v4658_v11 = vld [vmem:[#allocation5 + $0x5d4] sm:$0xf0] }
  0x97   :  { %1538 = vmatpush.bf16.msra.mxu3 %v3230_v14  ;;  %v4528_v14 = vld [vmem:[#allocation5 + $0x1cc] sm:$0xf]  ;;  %v3790_v17 = vor.u32 %v4658_v11, %v3789_v10  ;;  %v3071_v10 = vld [vmem:[#allocation5 + $0x38] sm:$0xf0] }
  0x98   :  { %1553 = vmatpush.bf16.msrb.mxu0 %v3326_v33  ;;  %v3282_v21 = vor.u32 %v4528_v14, %v3279_v15  ;;  %v4638_v14 = vld [vmem:[#allocation5 + $0x534] sm:$0xf0]  ;;  %v3565_v15 = vld [vmem:[#allocation5 + $0x408] sm:$0xf] }
  0x99   :  { %1527 = vmatpush.bf16.msrb.mxu1 %v3070_v29 }
  0x9a   :  { %1565 = vmatpush.bf16.msra.mxu2 %v3470_v23  ;;  %v4654_v23 = vld [vmem:[#allocation5 + $0x5b4] sm:$0xf0] }
  0x9b   :  { %1539 = vmatpush.bf16.msra.mxu3 %v3214_v26  ;;  %v4524_v26 = vld [vmem:[#allocation5 + $0x1ac] sm:$0xf]  ;;  %v3774_v29 = vor.u32 %v4654_v23, %v3773_v22  ;;  %v3710_v22 = vor.u32 %v4638_v14, %v3709_v13  ;;  %v3693_v23 = vld [vmem:[#allocation5 + $0x508] sm:$0xf]  ;;  %v3503_v14 = vld [vmem:[#allocation5 + $0x398] sm:$0xf0] }
  0x9c   :  { %1554 = vmatpush.bf16.msrb.mxu0 %v3310_v55  ;;  %v3266_v33 = vor.u32 %v4524_v26, %v3263_v27  ;;  %v3231_v55 = vld [vmem:[#allocation5 + $0x178] sm:$0xf0] }
  0x9d   :  { %1528 = vmatpush.bf16.msrb.mxu1 %v3054_v49  ;;  %v3741_v49 = vld [vmem:[#allocation5 + $0x568] sm:$0xf] }
  0x9e   :  { %1566 = vmatpush.bf16.msra.mxu2 %v3454_v38  ;;  %v4614_v38 = vld [vmem:[#allocation5 + $0x474] sm:$0xf0]  ;;  %v3742_v58 = vor.u32 %v4646_v50, %v3741_v49  ;;  %v3535_v50 = vld [vmem:[#allocation5 + $0x3d8] sm:$0xf0] }
  0x9f   :  { %1540 = vmatpush.bf16.msra.mxu3 %v3198_v44  ;;  %1555 = vmatmul.bf16.vlgmr.msrb.gmra.mxu0 %v5085_v53  ;;  %v4484_v44 = vld [vmem:[#allocation5 + $0x6c] sm:$0xf]  ;;  %v3614_v46 = vor.u32 %v4614_v38, %v3613_v37  ;;  %v3407_v37 = vld [vmem:[#allocation5 + $0x2d8] sm:$0xf0] }
  0xa0   :  { %1606 = vmatpush.bf16.msra.mxu0 %v3822_v63  ;;  %1529 = vmatmul.bf16.vlgmr.msrb.gmra.mxu1 %v5087_v57  ;;  %v3106_v56 = vor.u32 %v4484_v44, %v3103_v45  ;;  %v4504_v38 = vld [vmem:[#allocation5 + $0x10c] sm:$0xf] }
  0xa1   :  { %1573 = vmatpush.bf16.msra.mxu1 %v3678_v54  ;;  %v4516_v54 = vld [vmem:[#allocation5 + $0x16c] sm:$0xf]  ;;  %v3186_v49 = vor.u32 %v4504_v38, %v3183_v40 }
  0xa2   :  { %1567 = vmatpush.bf16.msra.mxu2 %v3438_v61  ;;  %v3087_v61 = vld [vmem:[#allocation5 + $0x58] sm:$0xf0]  ;;  %v3234_v63 = vor.u32 %v4516_v54, %v3231_v55  ;;  %v4556_v55 = vld [vmem:[#allocation5 + $0x2ac] sm:$0xf] }
  0xa3   :  { %1541 = vmatpush.bf16.msra.mxu3 %v3182_v2  ;;  %v3581_v2 = vld [vmem:[#allocation5 + $0x428] sm:$0xf]  ;;  %v3090_v6 = vor.u32 %v4480_v59, %v3087_v61  ;;  %v3791_v59 = vld [vmem:[#allocation5 + $0x5d8] sm:$0xf0]  ;;  %v4576_v40 = vld [vmem:[#allocation5 + $0x34c] sm:$0xf] }
  0xa4   :  { %1625 = vmatpush.bf16.msrb.mxu0 %v3298_v8  ;;  %v4476_v8 = vld [vmem:[#allocation5 + $0x2c] sm:$0xf] }
  0xa5   :  { %1574 = vmatpush.bf16.msra.mxu1 %v3662_v7  ;;  %1568 = vmatmul.bf16.vlgmr.msra.gmra.mxu2 %v5089_v60  ;;  %v3726_v7 = vor.u32 %v4642_v1, %v3725_v0  ;;  %v3074_v19 = vor.u32 %v4476_v8, %v3071_v10  ;;  %v3519_v1 = vld [vmem:[#allocation5 + $0x3b8] sm:$0xf0] }
  0xa6   :  { %1612 = vmatpush.bf16.msrb.mxu2 %v3170_v3  ;;  %1542 = vmatmul.bf16.vlgmr.msra.gmra.mxu3 %v5093_v9  ;;  %v4606_v3 = vld [vmem:[#allocation5 + $0x434] sm:$0xf0]  ;;  %v3775_v8 = vld [vmem:[#allocation5 + $0x5b8] sm:$0xf0] }
  0xa7   :  { %1586 = vmatpush.bf16.msrb.mxu3 %v3806_v4  ;;  %v4512_v4 = vld [vmem:[#allocation5 + $0x14c] sm:$0xf]  ;;  %v3582_v11 = vor.u32 %v4606_v3, %v3581_v2  ;;  %v3647_v3 = vld [vmem:[#allocation5 + $0x4b8] sm:$0xf0] }
  0xa8   :  { %1626 = vmatpush.bf16.msrb.mxu0 %v3282_v21  ;;  %v3218_v12 = vor.u32 %v4512_v4, %v3215_v5  ;;  %v3423_v21 = vld [vmem:[#allocation5 + $0x2f8] sm:$0xf0]  ;;  %v4620_v2 = vld [vmem:[#allocation5 + $0x4ac] sm:$0xf] }
  0xa9   :  { %1575 = vmatpush.bf16.msra.mxu1 %v3646_v20  ;;  %v4564_v20 = vld [vmem:[#allocation5 + $0x2ec] sm:$0xf] }
  0xaa   :  { %1613 = vmatpush.bf16.msrb.mxu2 %v3154_v16  ;;  %v4602_v16 = vld [vmem:[#allocation5 + $0x414] sm:$0xf0]  ;;  %v3426_v31 = vor.u32 %v4564_v20, %v3423_v21  ;;  %v4552_v5 = vld [vmem:[#allocation5 + $0x28c] sm:$0xf]  ;;  %v3759_v21 = vld [vmem:[#allocation5 + $0x598] sm:$0xf0] }
  0xab   :  { %1587 = vmatpush.bf16.msrb.mxu3 %v3790_v17  ;;  %v4508_v17 = vld [vmem:[#allocation5 + $0x12c] sm:$0xf]  ;;  %v3566_v26 = vor.u32 %v4602_v16, %v3565_v15  ;;  %v3631_v16 = vld [vmem:[#allocation5 + $0x498] sm:$0xf0] }
  0xac   :  { %1627 = vmatpush.bf16.msrb.mxu0 %v3266_v33  ;;  %v3202_v27 = vor.u32 %v4508_v17, %v3199_v18  ;;  %v3679_v33 = vld [vmem:[#allocation5 + $0x4f8] sm:$0xf0]  ;;  %v4616_v15 = vld [vmem:[#allocation5 + $0x48c] sm:$0xf] }
  0xad   :  { %1576 = vmatpush.bf16.msra.mxu1 %v3630_v32  ;;  %v4628_v32 = vld [vmem:[#allocation5 + $0x4ec] sm:$0xf] }
  0xae   :  { %1614 = vmatpush.bf16.msrb.mxu2 %v3138_v28  ;;  %v4634_v28 = vld [vmem:[#allocation5 + $0x514] sm:$0xf0]  ;;  %v3682_v45 = vor.u32 %v4628_v32, %v3679_v33  ;;  %v4548_v18 = vld [vmem:[#allocation5 + $0x26c] sm:$0xf]  ;;  %v3743_v33 = vld [vmem:[#allocation5 + $0x578] sm:$0xf0] }
  0xaf   :  { %1588 = vmatpush.bf16.msrb.mxu3 %v3774_v29  ;;  %3829 = vmatmul.msk.bf16.vlgmr.msra.gmra.mxu0 %vm1335_vm0, %v5097_v48  ;;  %v4596_v29 = vld [vmem:[#allocation5 + $0x3ec] sm:$0xf]  ;;  %v3694_v41 = vor.u32 %v4634_v28, %v3693_v23  ;;  %v3634_v23 = vor.u32 %v4616_v15, %v3631_v16  ;;  %v3615_v28 = vld [vmem:[#allocation5 + $0x478] sm:$0xf0] }
  0xb0   :  { %1628 = vmatpush.bf16.msrb.mxu0 %v3250_v47  ;;  %v3554_v44 = vor.u32 %v4596_v29, %v3551_v30  ;;  %v3410_v47 = vor.u32 %v4560_v35, %v3407_v37  ;;  %v4544_v30 = vld [vmem:[#allocation5 + $0x24c] sm:$0xf]  ;;  %v316_v35 = vld [vmem:[#allocation7] sm:$0xf]  ;;  %v3439_v15 = vld [vmem:[#allocation5 + $0x318] sm:$0xf0] }
  0xb1   :  { %1577 = vmatpush.bf16.msra.mxu1 %v3614_v46  ;;  %v4592_v46 = vld [vmem:[#allocation5 + $0x3cc] sm:$0xf] }
  0xb2   :  { %1615 = vmatpush.bf16.msrb.mxu2 %v3122_v42  ;;  %v4660_v42 = vld [vmem:[#allocation5 + $0x5ec] sm:$0xf]  ;;  %v3538_v61 = vor.u32 %v4592_v46, %v3535_v50 }
  0xb3   :  { %1589 = vmatpush.bf16.msrb.mxu3 %v3758_v43  ;;  %v3807_v43 = vld [vmem:[#allocation5 + $0x5f8] sm:$0xf0]  ;;  %v4644_v32 = vld [vmem:[#allocation5 + $0x56c] sm:$0xf] }
  0xb4   :  { %1629 = vmatpush.bf16.msrb.mxu0 %v3234_v63  ;;  %v3810_v54 = vor.u32 %v4660_v42, %v3807_v43  ;;  %v4588_v63 = vld [vmem:[#allocation5 + $0x3ac] sm:$0xf]  ;;  %v3471_v43 = vld [vmem:[#allocation5 + $0x358] sm:$0xf0]  ;;  %v3746_v46 = vor.u32 %v4644_v32, %v3743_v33  ;;  %v3929_v32 = vld [vmem:[#allocation8 + $0xc0] sm:$0xf] }
  0xb5   :  { %1578 = vmatpush.bf16.msra.mxu1 %v3598_v62  ;;  %v3666_v62 = vor.u32 %v4624_v51, %v3663_v52  ;;  %v3522_v10 = vor.u32 %v4588_v63, %v3519_v1  ;;  %v4640_v51 = vld [vmem:[#allocation5 + $0x54c] sm:$0xf]  ;;  %v3727_v52 = vld [vmem:[#allocation5 + $0x558] sm:$0xf0]  ;;  %v4693_v33 = vld [vmem:[#allocation8 + $0xcc] sm:$0xf0] }
  0xb6   :  { %1616 = vmatpush.bf16.msrb.mxu2 %v3106_v56  ;;  %v3391_v56 = vld [vmem:[#allocation5 + $0x2b8] sm:$0xf0]  ;;  %v4536_v1 = vld [vmem:[#allocation5 + $0x20c] sm:$0xf] }
  0xb7   :  { %1590 = vmatpush.bf16.msrb.mxu3 %v3742_v58  ;;  %v4656_v58 = vld [vmem:[#allocation5 + $0x5cc] sm:$0xf]  ;;  %v3394_v0 = vor.u32 %v4556_v55, %v3391_v56  ;;  %v3474_v55 = vor.u32 %v4576_v40, %v3471_v43  ;;  %v3583_v63 = vld [vmem:[#allocation5 + $0x438] sm:$0xf0]  ;;  %v3930_v43 = vor.u32 %v4693_v33, %v3929_v32  ;;  %v4075_v32 = vld [vmem:[#allocation8 + $0x1f0] sm:$0xf0] }
  0xb8   :  { %1630 = vmatpush.bf16.msrb.mxu0 %v3218_v12  ;;  %v3794_v4 = vor.u32 %v4656_v58, %v3791_v59  ;;  %v4584_v12 = vld [vmem:[#allocation5 + $0x38c] sm:$0xf] }
  0xb9   :  { %1579 = vmatpush.bf16.msra.mxu1 %v3582_v11  ;;  %v3650_v11 = vor.u32 %v4620_v2, %v3647_v3  ;;  %v4572_v58 = vld [vmem:[#allocation5 + $0x32c] sm:$0xf]  ;;  %v3311_v2 = vld [vmem:[#allocation5 + $0x218] sm:$0xf0] }
  0xba   :  { %1617 = vmatpush.bf16.msrb.mxu2 %v3090_v6  ;;  %v3375_v6 = vld [vmem:[#allocation5 + $0x298] sm:$0xf0]  ;;  %v4636_v3 = vld [vmem:[#allocation5 + $0x52c] sm:$0xf] }
  0xbb   :  { %1591 = vmatpush.bf16.msrb.mxu3 %v3726_v7  ;;  %v4652_v7 = vld [vmem:[#allocation5 + $0x5ac] sm:$0xf]  ;;  %v3378_v13 = vor.u32 %v4552_v5, %v3375_v6  ;;  %v5125_v20 = vpop.f32.mrf.mxu0  ;;  %v3711_v5 = vld [vmem:[#allocation5 + $0x538] sm:$0xf0] }
  0xbc   :  { %1631 = vmatpush.bf16.msrb.mxu0 %v3202_v27  ;;  %v3778_v17 = vor.u32 %v4652_v7, %v3775_v8  ;;  %v4612_v27 = vld [vmem:[#allocation5 + $0x46c] sm:$0xf]  ;;  %v5127_v29 = vpop.f32.mrf.mxu1  ;;  %v3823_v7 = vld [vmem:[#allocation5 + $0x618] sm:$0xf0] }
  0xbd   :  { %1580 = vmatpush.bf16.msra.mxu1 %v3566_v26  ;;  %v3487_v26 = vld [vmem:[#allocation5 + $0x378] sm:$0xf0]  ;;  %v3618_v38 = vor.u32 %v4612_v27, %v3615_v28  ;;  %v4664_v6 = vld [vmem:[#allocation5 + $0x60c] sm:$0xf] }
  0xbe   :  { %1618 = vmatpush.bf16.msrb.mxu2 %v3074_v19  ;;  %v3359_v19 = vld [vmem:[#allocation5 + $0x278] sm:$0xf0]  ;;  %v3490_v37 = vor.u32 %v4580_v24, %v3487_v26  ;;  %v4600_v16 = vld [vmem:[#allocation5 + $0x40c] sm:$0xf]  ;;  %v4729_v26 = vld [vmem:[#allocation8 + $0x1ec] sm:$0xf0] }
  0xbf   :  { %1592 = vmatpush.bf16.msrb.mxu3 %v3710_v22  ;;  %v3506_v22 = vor.u32 %v4584_v12, %v3503_v14  ;;  %v3362_v25 = vor.u32 %v4548_v18, %v3359_v19  ;;  %v3314_v14 = vor.u32 %v4536_v1, %v3311_v2  ;;  %v3714_v19 = vor.u32 %v4636_v3, %v3711_v5  ;;  %v3695_v24 = vld [vmem:[#allocation5 + $0x518] sm:$0xf0]  ;;  %v4677_v5 = vld [vmem:[#allocation8 + $0x4c] sm:$0xf0] }
  0xc0   :  { %1581 = vmatmul.bf16.vlgmr.msra.gmra.mxu1 %v5101_v34  ;;  %1632 = vmatpush.bf16.msrb.mxu0 %v3186_v49  ;;  %v3327_v49 = vld [vmem:[#allocation5 + $0x238] sm:$0xf0] }
  0xc1   :  { %1638 = vmatpush.bf16.msrb.mxu1 %v3426_v31  ;;  %v3343_v31 = vld [vmem:[#allocation5 + $0x258] sm:$0xf0] }
  0xc2   :  { %1619 = vmatpush.bf16.msrb.mxu2 %v3058_v36 }
  0xc3   :  { %1593 = vmatpush.bf16.msrb.mxu3 %v3694_v41  ;;  %1633 = vmatmul.bf16.vlgmr.msrb.gmra.mxu0 %v5093_v9  ;;  %v5129_v36 = vpop.f32.mrf.mxu2  ;;  %v3346_v41 = vor.u32 %v4544_v30, %v3343_v31  ;;  %v1350_v50 = vpop.f32.mrf.mxu0 }
  0xc4   :  { %1677 = vmatpush.bf16.msra.mxu0 %v3810_v54  ;;  %v5133_v54 = vunpack.c.l.bf16 %v316_v35 }
  0xc5   :  { %1639 = vmatpush.bf16.msrb.mxu1 %v3410_v47  ;;  %1620 = vmatmul.bf16.vlgmr.msrb.gmra.mxu2 %v5087_v57  ;;  %v4648_v57 = vld [vmem:[#allocation5 + $0x58c] sm:$0xf]  ;;  %v5131_v42 = vpop.f32.mrf.mxu3 }
  0xc6   :  { %1664 = vmatpush.bf16.msra.mxu2 %v3682_v45  ;;  %1594 = vmatmul.bf16.vlgmr.msrb.gmra.mxu3 %v5103_v39  ;;  %v3762_v9 = vor.u32 %v4648_v57, %v3759_v21  ;;  %v3599_v45 = vld [vmem:[#allocation5 + $0x458] sm:$0xf0]  ;;  %v4540_v47 = vld [vmem:[#allocation5 + $0x22c] sm:$0xf]  ;;  %v319_v8 = vperm.slane %v5133_v54, 0 }
  0xc7   :  { %1651 = vmatpush.bf16.msra.mxu3 %v3554_v44  ;;  %v4608_v44 = vld [vmem:[#allocation5 + $0x44c] sm:$0xf]  ;;  %v3330_v59 = vor.u32 %v4540_v47, %v3327_v49  ;;  %v3945_v57 = vld [vmem:[#allocation8 + $0xe0] sm:$0xf]  ;;  %v4697_v21 = vld [vmem:[#allocation8 + $0xec] sm:$0xf0] }
  0xc8   :  { %1678 = vmatpush.bf16.msra.mxu0 %v3794_v4  ;;  %v3602_v56 = vor.u32 %v4608_v44, %v3599_v45  ;;  %v1363_v4 = vpop.f32.mrf.mxu1  ;;  %v327_v27 = vperm.slane %v319_v8, 0  ;;  %v3946_v30 = vor.u32 %v4697_v21, %v3945_v57  ;;  %v3913_v44 = vld [vmem:[#allocation8 + $0xa0] sm:$0xf]  ;;  %v4689_v45 = vld [vmem:[#allocation8 + $0xac] sm:$0xf0] }
  0xc9   :  { %1640 = vmatpush.bf16.msrb.mxu1 %v3394_v0  ;;  %v3730_v0 = vor.u32 %v4640_v51, %v3727_v52  ;;  %v4041_v47 = vld [vmem:[#allocation8 + $0x1a0] sm:$0xf]  ;;  %v4721_v49 = vld [vmem:[#allocation8 + $0x1ac] sm:$0xf0] }
  0xca   :  { %1665 = vmatpush.bf16.msra.mxu2 %v3666_v62  ;;  %v4604_v62 = vld [vmem:[#allocation5 + $0x42c] sm:$0xf]  ;;  %v1349_v40 = vadd.f32 %v5125_v20, %v327_v27  ;;  %v3897_v20 = vld [vmem:[#allocation8 + $0x80] sm:$0xf]  ;;  %v4685_v51 = vld [vmem:[#allocation8 + $0x8c] sm:$0xf0]  ;;  %v4042_v52 = vor.u32 %v4721_v49, %v4041_v47 }
  0xcb   :  { %1652 = vmatpush.bf16.msra.mxu3 %v3538_v61  ;;  %v3455_v61 = vld [vmem:[#allocation5 + $0x338] sm:$0xf0]  ;;  %v3586_v12 = vor.u32 %v4604_v62, %v3583_v63  ;;  %v3898_v62 = vor.u32 %v4685_v51, %v3897_v20  ;;  %v4681_v63 = vld [vmem:[#allocation8 + $0x6c] sm:$0xf0]  ;;  %v3865_v4 = vld [vmem:[#allocation8 + $0x40] sm:$0xf] }
  0xcc   :  { %1679 = vmatpush.bf16.msra.mxu0 %v3778_v17  ;;  %v3567_v17 = vld [vmem:[#allocation5 + $0x418] sm:$0xf0]  ;;  %v1362_v50 = vadd.f32 %v5127_v29, %v1349_v40  ;;  %v3881_v29 = vld [vmem:[#allocation8 + $0x60] sm:$0xf]  ;;  %v4709_v8 = vld [vmem:[#allocation8 + $0x14c] sm:$0xf0] }
  0xcd   :  { %1641 = vmatpush.bf16.msrb.mxu1 %v3378_v13  ;;  %v4568_v13 = vld [vmem:[#allocation5 + $0x30c] sm:$0xf]  ;;  %v1389_v18 = vpop.f32.mrf.mxu3  ;;  %v3882_v2 = vor.u32 %v4681_v63, %v3881_v29  ;;  %v3833_v57 = vld [vmem:[#allocation8] sm:$0xf]  ;;  %v4669_v21 = vld [vmem:[#allocation8 + $0xc] sm:$0xf0] }
  0xce   :  { %1666 = vmatpush.bf16.msra.mxu2 %v3650_v11  ;;  %v3458_v11 = vor.u32 %v4572_v58, %v3455_v61  ;;  %v3442_v28 = vor.u32 %v4568_v13, %v3439_v15  ;;  %v4717_v58 = vld [vmem:[#allocation8 + $0x18c] sm:$0xf0]  ;;  %v3947_v27 = vld [vmem:[#allocation8 + $0xf0] sm:$0xf0]  ;;  %v3834_v33 = vor.u32 %v4669_v21, %v3833_v57  ;;  %v4723_v49 = vld [vmem:[#allocation8 + $0x1c4] sm:$0xf] }
  0xcf   :  { %1653 = vmatpush.bf16.msra.mxu3 %v3522_v10  ;;  %v1376_v10 = vpop.f32.mrf.mxu2  ;;  %v4673_v15 = vld [vmem:[#allocation8 + $0x2c] sm:$0xf0]  ;;  %v4169_v51 = vld [vmem:[#allocation8 + $0x2a0] sm:$0xf] }
  0xd0   :  { %1680 = vmatpush.bf16.msra.mxu0 %v3762_v9  ;;  %v3570_v9 = vor.u32 %v4600_v16, %v3567_v17  ;;  %v3977_v17 = vld [vmem:[#allocation8 + $0x120] sm:$0xf]  ;;  %v4705_v18 = vld [vmem:[#allocation8 + $0x12c] sm:$0xf0] }
  0xd1   :  { %1642 = vmatpush.bf16.msrb.mxu1 %v3362_v25  ;;  %v4073_v25 = vld [vmem:[#allocation8 + $0x1e0] sm:$0xf]  ;;  %v4749_v63 = vld [vmem:[#allocation8 + $0x28c] sm:$0xf0] }
  0xd2   :  { %1667 = vmatpush.bf16.msra.mxu2 %v3634_v23  ;;  %v3826_v23 = vor.u32 %v4664_v6, %v3823_v7  ;;  %v4074_v35 = vor.u32 %v4729_v26, %v4073_v25  ;;  %v3993_v7 = vld [vmem:[#allocation8 + $0x140] sm:$0xf]  ;;  %v4761_v25 = vld [vmem:[#allocation8 + $0x2ec] sm:$0xf0] }
  0xd3   :  { %1654 = vmatpush.bf16.msra.mxu3 %v3506_v22  ;;  %v4632_v22 = vld [vmem:[#allocation5 + $0x50c] sm:$0xf]  ;;  %v3994_v16 = vor.u32 %v4709_v8, %v3993_v7  ;;  %v4153_v29 = vld [vmem:[#allocation8 + $0x280] sm:$0xf]  ;;  %v4745_v8 = vld [vmem:[#allocation8 + $0x26c] sm:$0xf0] }
  0xd4   :  { %1681 = vmatpush.bf16.msra.mxu0 %v3746_v46  ;;  %v3698_v31 = vor.u32 %v4632_v22, %v3695_v24  ;;  %v4201_v24 = vld [vmem:[#allocation8 + $0x2e0] sm:$0xf]  ;;  %v4741_v57 = vld [vmem:[#allocation8 + $0x24c] sm:$0xf0] }
  0xd5   :  { %1643 = vmatpush.bf16.msrb.mxu1 %v3346_v41  ;;  %v4137_v7 = vld [vmem:[#allocation8 + $0x260] sm:$0xf] }
  0xd6   :  { %1668 = vmatpush.bf16.msra.mxu2 %v3618_v38  ;;  %v4725_v38 = vld [vmem:[#allocation8 + $0x1cc] sm:$0xf0] }
  0xd7   :  { %1655 = vmatpush.bf16.msra.mxu3 %v3490_v37  ;;  %v4057_v37 = vld [vmem:[#allocation8 + $0x1c0] sm:$0xf]  ;;  %v5138_v41 = vpop.f32.mrf.mxu2 }
  0xd8   :  { %1682 = vmatpush.bf16.msra.mxu0 %v3730_v0  ;;  %v4058_v46 = vor.u32 %v4725_v38, %v4057_v37  ;;  %v4009_v0 = vld [vmem:[#allocation8 + $0x160] sm:$0xf] }
  0xd9   :  { %1644 = vmatpush.bf16.msrb.mxu1 %v3330_v59  ;;  %v1375_v59 = vadd.f32 %v5129_v36, %v1362_v50  ;;  %v4059_v50 = vld [vmem:[#allocation8 + $0x1d0] sm:$0xf0] }
  0xda   :  { %1669 = vmatpush.bf16.msra.mxu2 %v3602_v56  ;;  %v4025_v56 = vld [vmem:[#allocation8 + $0x180] sm:$0xf] }
  0xdb   :  { %1656 = vmatpush.bf16.msra.mxu3 %v3474_v55  ;;  %v1388_v1 = vadd.f32 %v5131_v42, %v1375_v59 }
  0xdc   :  { %1683 = vmatpush.bf16.msra.mxu0 %v3714_v19  ;;  %v1400_v55 = vpop.f32.mrf.mxu0 }
  0xdd   :  { %1645 = vmatpush.bf16.msrb.mxu1 %v3314_v14  ;;  %v1401_v3 = vadd.f32 %v1400_v55, %v1388_v1  ;;  %v3849_v14 = vld [vmem:[#allocation8 + $0x20] sm:$0xf]  ;;  %v4687_v55 = vld [vmem:[#allocation8 + $0xa4] sm:$0xf] }
  0xde   :  { %1670 = vmatpush.bf16.msra.mxu2 %v3586_v12  ;;  %v3866_v12 = vor.u32 %v4677_v5, %v3865_v4  ;;  %v3850_v19 = vor.u32 %v4673_v15, %v3849_v14  ;;  %v4027_v4 = vld [vmem:[#allocation8 + $0x190] sm:$0xf0]  ;;  %v4138_v15 = vor.u32 %v4745_v8, %v4137_v7  ;;  %v4793_v7 = vld [vmem:[#allocation8 + $0x3ec] sm:$0xf0] }
  0xdf   :  { %1657 = vmatpush.bf16.msra.mxu3 %v3458_v11  ;;  %v1428_v61 = vpop.f32.mrf.mxu2 }
  0xe0   :  { %1646 = vmatmul.bf16.vlgmr.msrb.gmra.mxu1 %v5085_v53  ;;  %1684 = vmatpush.bf16.msra.mxu0 %v3698_v31  ;;  %v3914_v53 = vor.u32 %v4689_v45, %v3913_v44  ;;  %v4727_v31 = vld [vmem:[#allocation8 + $0x1e4] sm:$0xf]  ;;  %v3931_v45 = vld [vmem:[#allocation8 + $0xd0] sm:$0xf0] }
  0xe1   :  { %1697 = vmatpush.bf16.msra.mxu1 %v3826_v23  ;;  %v3978_v23 = vor.u32 %v4705_v18, %v3977_v17  ;;  %v4691_v44 = vld [vmem:[#allocation8 + $0xc4] sm:$0xf]  ;;  %v4043_v61 = vld [vmem:[#allocation8 + $0x1b0] sm:$0xf0] }
  0xe2   :  { %1671 = vmatpush.bf16.msra.mxu2 %v3570_v9  ;;  %v4701_v9 = vld [vmem:[#allocation8 + $0x10c] sm:$0xf0]  ;;  %v3934_v20 = vor.u32 %v4691_v44, %v3931_v45  ;;  %v4011_v17 = vld [vmem:[#allocation8 + $0x170] sm:$0xf0]  ;;  %v4667_v45 = vld [vmem:[#allocation8 + $0x4] sm:$0xf] }
  0xe3   :  { %1658 = vmatpush.bf16.msra.mxu3 %v3442_v28  ;;  %1685 = vmatmul.bf16.vlgmr.msra.gmra.mxu0 %v5103_v39  ;;  %v4713_v39 = vld [vmem:[#allocation8 + $0x16c] sm:$0xf0]  ;;  %v3961_v28 = vld [vmem:[#allocation8 + $0x100] sm:$0xf] }
  0xe4   :  { %v4010_v6 = vor.u32 %v4713_v39, %v4009_v0  ;;  %v1402_v10 = vpop.f32.mrf.mxu0  ;;  %v3962_v40 = vor.u32 %v4701_v9, %v3961_v28  ;;  %v4683_v0 = vld [vmem:[#allocation8 + $0x84] sm:$0xf]  ;;  %v3899_v39 = vld [vmem:[#allocation8 + $0x90] sm:$0xf0] }
  0xe5   :  { %2507 = vmatpush.bf16.msrb.mxu1 %v4074_v35  ;;  %1672 = vmatmul.bf16.vlgmr.msra.gmra.mxu2 %v5101_v34  ;;  %v4026_v34 = vor.u32 %v4717_v58, %v4025_v56  ;;  %v5146_v36 = vpop.f32.mrf.mxu3  ;;  %v3915_v56 = vld [vmem:[#allocation8 + $0xb0] sm:$0xf0]  ;;  %v4062_v58 = vor.u32 %v4723_v49, %v4059_v50  ;;  %v4089_v49 = vld [vmem:[#allocation8 + $0x200] sm:$0xf]  ;;  %v4733_v50 = vld [vmem:[#allocation8 + $0x20c] sm:$0xf0] }
  0xe6   :  { %1659 = vmatmul.bf16.vlgmr.msra.gmra.mxu3 %v5089_v60  ;;  %v1413_v60 = vpop.f32.mrf.mxu1 }
  0xe7   :  { %2494 = vmatpush.bf16.msrb.mxu3 %v3946_v30  ;;  %v1414_v42 = vadd.f32 %v1413_v60, %v1401_v3  ;;  %v4202_v30 = vor.u32 %v4761_v25, %v4201_v24  ;;  %v4719_v60 = vld [vmem:[#allocation8 + $0x1a4] sm:$0xf] }
  0xe8   :  { %v5150_v13 = vpop.f32.mrf.mxu2  ;;  %v4046_v1 = vor.u32 %v4719_v60, %v4043_v61  ;;  %v4715_v3 = vld [vmem:[#allocation8 + $0x184] sm:$0xf]  ;;  %v3963_v60 = vld [vmem:[#allocation8 + $0x110] sm:$0xf0] }
  0xe9   :  { %2508 = vmatpush.bf16.msrb.mxu1 %v4058_v46  ;;  %v1427_v22 = vadd.f32 %v5138_v41, %v1414_v42  ;;  %2520 = vmatpush.bf16.msrb.mxu2 %v4202_v30  ;;  %v4185_v41 = vld [vmem:[#allocation8 + $0x2c0] sm:$0xf]  ;;  %v4078_v46 = vor.u32 %v4727_v31, %v4075_v32  ;;  %v3883_v42 = vld [vmem:[#allocation8 + $0x70] sm:$0xf0]  ;;  %v4030_v14 = vor.u32 %v4715_v3, %v4027_v4  ;;  %v4737_v32 = vld [vmem:[#allocation8 + $0x22c] sm:$0xf0] }
  0xea   :  { %v4105_v31 = vld [vmem:[#allocation8 + $0x220] sm:$0xf]  ;;  %v4187_v3 = vld [vmem:[#allocation8 + $0x2d0] sm:$0xf0]  ;;  %v4694_v4 = vld [vmem:[#allocation8 + $0xd4] sm:$0xf0] }
  0xeb   :  { %2495 = vmatpush.bf16.msrb.mxu3 %v3930_v43  ;;  %v1703_v37 = vmax.f32 %v1427_v22, 0.0  ;;  %v4757_v43 = vld [vmem:[#allocation8 + $0x2cc] sm:$0xf0]  ;;  %v4675_v22 = vld [vmem:[#allocation8 + $0x44] sm:$0xf] }
  0xec   :  { %v4186_v47 = vor.u32 %v4757_v43, %v4185_v41  ;;  %v4703_v41 = vld [vmem:[#allocation8 + $0x124] sm:$0xf]  ;;  %v3979_v43 = vld [vmem:[#allocation8 + $0x130] sm:$0xf0] }
  0xed   :  { %2509 = vmatpush.bf16.msrb.mxu1 %v4042_v52  ;;  %v1441_v26 = vpop.f32.mrf.mxu3  ;;  %v4753_v52 = vld [vmem:[#allocation8 + $0x2ac] sm:$0xf0] }
  0xee   :  { %v1415_v11 = vpop.f32.mrf.mxu1  ;;  %2521 = vmatpush.bf16.msrb.mxu2 %v4186_v47  ;;  %v4170_v59 = vor.u32 %v4753_v52, %v4169_v51  ;;  %v4707_v26 = vld [vmem:[#allocation8 + $0x144] sm:$0xf]  ;;  %v3835_v47 = vld [vmem:[#allocation8 + $0x10] sm:$0xf0]  ;;  %v3982_v51 = vor.u32 %v4703_v41, %v3979_v43 }
  0xef   :  { %2496 = vmatpush.bf16.msrb.mxu3 %v3914_v53  ;;  %v5153_v53 = vpack.c.bf16 %v1703_v37, %v1703_v37  ;;  %v3851_v37 = vld [vmem:[#allocation8 + $0x30] sm:$0xf0]  ;;  %v4759_v52 = vld [vmem:[#allocation8 + $0x2e4] sm:$0xf] }
  0xf0   :  { %3830 = vmatmul.msk.bf16.vlgmr.msra.gmra.mxu1 %vm1335_vm0, %v5097_v48  ;;  %v4695_v48 = vld [vmem:[#allocation8 + $0xe4] sm:$0xf]  ;;  %v1454_v35 = vpop.f32.mrf.mxu2  ;;  %v4139_v43 = vld [vmem:[#allocation8 + $0x270] sm:$0xf0] }
  0xf1   :  { %2510 = vmatpush.bf16.msrb.mxu1 %v4026_v34  ;;  %v3950_v38 = vor.u32 %v4695_v48, %v3947_v27  ;;  %v320_v34 = vperm.slane %v5133_v54, 2  ;;  %v3867_v48 = vld [vmem:[#allocation8 + $0x50] sm:$0xf0]  ;;  %v4671_v35 = vld [vmem:[#allocation8 + $0x24] sm:$0xf] }
  0xf2   :  { %2522 = vmatpush.bf16.msrb.mxu2 %v4170_v59  ;;  %v3995_v27 = vld [vmem:[#allocation8 + $0x150] sm:$0xf0]  ;;  %v3870_v30 = vor.u32 %v4675_v22, %v3867_v48  ;;  %v4699_v59 = vld [vmem:[#allocation8 + $0x104] sm:$0xf]  ;;  %v4730_v22 = vld [vmem:[#allocation8 + $0x1f4] sm:$0xf0] }
  0xf3   :  { %2497 = vmatpush.bf16.msrb.mxu3 %v3898_v62  ;;  %v3918_v62 = vor.u32 %v4687_v55, %v3915_v56  ;;  %v328_v10 = vperm.slane %v320_v34, 0  ;;  %v4203_v55 = vld [vmem:[#allocation8 + $0x2f0] sm:$0xf0]  ;;  %v4743_v41 = vld [vmem:[#allocation8 + $0x264] sm:$0xf] }
  0xf4   :  { %v4206_v61 = vor.u32 %v4759_v52, %v4203_v55 }
  0xf5   :  { %2511 = vmatpush.bf16.msrb.mxu1 %v4010_v6  ;;  %v3902_v6 = vor.u32 %v4683_v0, %v3899_v39  ;;  %v1440_v21 = vadd.f32 %v5146_v36, %v328_v10  ;;  %v3998_v36 = vor.u32 %v4707_v26, %v3995_v27  ;;  %v3937_v39 = vld [vmem:[#allocation8 + $0xc8] sm:$0xf]  ;;  %v4686_v26 = vld [vmem:[#allocation8 + $0x94] sm:$0xf0]  ;;  %v4747_v27 = vld [vmem:[#allocation8 + $0x284] sm:$0xf] }
  0xf7   :  { %2498 = vmatpush.bf16.msrb.mxu3 %v3882_v2  ;;  %v4154_v2 = vor.u32 %v4749_v63, %v4153_v29  ;;  %v3838_v29 = vor.u32 %v4667_v45, %v3835_v47  ;;  %v4682_v47 = vld [vmem:[#allocation8 + $0x74] sm:$0xf0] }
  0xf9   :  { %2512 = vmatpush.bf16.msrb.mxu1 %v3994_v16  ;;  %2523 = vmatpush.bf16.msrb.mxu2 %v4154_v2  ;;  %v4711_v16 = vld [vmem:[#allocation8 + $0x164] sm:$0xf] }
  0xfa   :  { %v4755_v2 = vld [vmem:[#allocation8 + $0x2c4] sm:$0xf] }
  0xfb   :  { %2499 = vmatpush.bf16.msrb.mxu3 %v3866_v12  ;;  %v4679_v12 = vld [vmem:[#allocation8 + $0x64] sm:$0xf] }
  0xfc   :  { %v1465_v5 = vpop.f32.mrf.mxu0  ;;  %v3886_v18 = vor.u32 %v4679_v12, %v3883_v42  ;;  %v3921_v12 = vld [vmem:[#allocation8 + $0xa8] sm:$0xf]  ;;  %v4751_v42 = vld [vmem:[#allocation8 + $0x2a4] sm:$0xf] }
  0xfd   :  { %2513 = vmatpush.bf16.msrb.mxu1 %v3978_v23  ;;  %v1478_v11 = vpop.f32.mrf.mxu1  ;;  %2524 = vmatpush.bf16.msrb.mxu2 %v4138_v15  ;;  %v4014_v23 = vor.u32 %v4711_v16, %v4011_v17  ;;  %v4690_v16 = vld [vmem:[#allocation8 + $0xb4] sm:$0xf0] }
  0xff   :  { %2500 = vmatpush.bf16.msrb.mxu3 %v3850_v19  ;;  %v4121_v19 = vld [vmem:[#allocation8 + $0x240] sm:$0xf] }
 0x100   :  { %v4122_v24 = vor.u32 %v4741_v57, %v4121_v19  ;;  %v4789_v19 = vld [vmem:[#allocation8 + $0x3cc] sm:$0xf0] }
 0x101   :  { %2514 = vmatpush.bf16.msrb.mxu1 %v3962_v40  ;;  %v4106_v40 = vor.u32 %v4737_v32, %v4105_v31  ;;  %v4785_v31 = vld [vmem:[#allocation8 + $0x3ac] sm:$0xf0] }
 0x102   :  { %2525 = vmatpush.bf16.msrb.mxu2 %v4122_v24 }
 0x103   :  { %2501 = vmatpush.bf16.msrb.mxu3 %v3834_v33  ;;  %v1453_v33 = vadd.f32 %v5150_v13, %v1440_v21  ;;  %v4090_v13 = vor.u32 %v4733_v50, %v4089_v49  ;;  %v4081_v21 = vld [vmem:[#allocation8 + $0x1e8] sm:$0xf]  ;;  %v4142_v49 = vor.u32 %v4743_v41, %v4139_v43  ;;  %v4281_v50 = vld [vmem:[#allocation8 + $0x380] sm:$0xf]  ;;  %v4692_v41 = vld [vmem:[#allocation8 + $0xcc] sm:$0xf] }
 0x104   :  { %v1467_v28 = vpop.f32.mrf.mxu0 }
 0x105   :  { %2559 = vmatpush.bf16.msra.mxu1 %v4078_v46  ;;  %v1491_v25 = vpop.f32.mrf.mxu3  ;;  %v1466_v44 = vadd.f32 %v1465_v5, %v1453_v33  ;;  %v3854_v46 = vor.u32 %v4671_v35, %v3851_v37  ;;  %v4190_v5 = vor.u32 %v4755_v2, %v4187_v3  ;;  %v4082_v28 = vor.u32 %v4730_v22, %v4081_v21  ;;  %v4065_v33 = vld [vmem:[#allocation8 + $0x1c8] sm:$0xf]  ;;  %v4726_v35 = vld [vmem:[#allocation8 + $0x1d4] sm:$0xf0]  ;;  %v4731_v22 = vld [vmem:[#allocation8 + $0x204] sm:$0xf] }
 0x106   :  { %2502 = vmatmul.bf16.vlgmr.msrb.gmra.mxu3 %v5153_v53  ;;  %2526 = vmatpush.bf16.msrb.mxu2 %v4106_v40  ;;  %v3889_v40 = vld [vmem:[#allocation8 + $0x68] sm:$0xf]  ;;  %v4670_v21 = vld [vmem:[#allocation8 + $0x14] sm:$0xf0] }
 0x107   :  { %2546 = vmatpush.bf16.msra.mxu3 %v3950_v38  ;;  %v1480_v38 = vpop.f32.mrf.mxu1  ;;  %v3857_v3 = vld [vmem:[#allocation8 + $0x28] sm:$0xf] }
 0x108   :  { %v1504_v9 = vpop.f32.mrf.mxu2 }
 0x109   :  { %2560 = vmatpush.bf16.msra.mxu1 %v4062_v58  ;;  %v4698_v58 = vld [vmem:[#allocation8 + $0xf4] sm:$0xf0] }
 0x10a   :  { %2527 = vmatpush.bf16.msrb.mxu2 %v4090_v13  ;;  %v4722_v13 = vld [vmem:[#allocation8 + $0x1b4] sm:$0xf0] }
 0x10b   :  { %2547 = vmatpush.bf16.msra.mxu3 %v3934_v20  ;;  %v3953_v20 = vld [vmem:[#allocation8 + $0xe8] sm:$0xf] }
 0x10c   :  { %v3954_v0 = vor.u32 %v4698_v58, %v3953_v20  ;;  %v4781_v20 = vld [vmem:[#allocation8 + $0x38c] sm:$0xf0]  ;;  %v3873_v58 = vld [vmem:[#allocation8 + $0x48] sm:$0xf] }
 0x10d   :  { %2561 = vmatpush.bf16.msra.mxu1 %v4046_v1  ;;  %v1493_v56 = vpop.f32.mrf.mxu3  ;;  %v3966_v1 = vor.u32 %v4699_v59, %v3963_v60  ;;  %v4282_v52 = vor.u32 %v4781_v20, %v4281_v50  ;;  %v4739_v59 = vld [vmem:[#allocation8 + $0x244] sm:$0xf]  ;;  %v4123_v60 = vld [vmem:[#allocation8 + $0x250] sm:$0xf0] }
 0x10e   :  { %2572 = vmatpush.bf16.msra.mxu2 %v4206_v61  ;;  %v3890_v56 = vor.u32 %v4682_v47, %v3889_v40  ;;  %v4765_v47 = vld [vmem:[#allocation8 + $0x30c] sm:$0xf0]  ;;  %v4791_v20 = vld [vmem:[#allocation8 + $0x3e4] sm:$0xf] }
 0x10f   :  { %2548 = vmatpush.bf16.msra.mxu3 %v3918_v62  ;;  %v1479_v62 = vadd.f32 %v1478_v11, %v1466_v44  ;;  %v3938_v11 = vor.u32 %v4694_v4, %v3937_v39  ;;  %v4718_v39 = vld [vmem:[#allocation8 + $0x194] sm:$0xf0]  ;;  %v4735_v4 = vld [vmem:[#allocation8 + $0x224] sm:$0xf] }
 0x110   :  { %v1506_v63 = vpop.f32.mrf.mxu2 }
 0x111   :  { %2562 = vmatpush.bf16.msra.mxu1 %v4030_v14  ;;  %v1492_v34 = vadd.f32 %v1491_v25, %v1479_v62  ;;  %v4171_v14 = vld [vmem:[#allocation8 + $0x2b0] sm:$0xf0]  ;;  %v3922_v25 = vor.u32 %v4690_v16, %v3921_v12  ;;  %v4678_v62 = vld [vmem:[#allocation8 + $0x54] sm:$0xf0]  ;;  %v4265_v63 = vld [vmem:[#allocation8 + $0x360] sm:$0xf] }
 0x112   :  { %2573 = vmatpush.bf16.msra.mxu2 %v4190_v5  ;;  %v4174_v17 = vor.u32 %v4751_v42, %v4171_v14  ;;  %v3874_v2 = vor.u32 %v4678_v62, %v3873_v58  ;;  %v4107_v5 = vld [vmem:[#allocation8 + $0x230] sm:$0xf0]  ;;  %v4249_v12 = vld [vmem:[#allocation8 + $0x340] sm:$0xf]  ;;  %v4773_v42 = vld [vmem:[#allocation8 + $0x34c] sm:$0xf0] }
 0x113   :  { %2549 = vmatpush.bf16.msra.mxu3 %v3902_v6  ;;  %v4329_v6 = vld [vmem:[#allocation8 + $0x3e0] sm:$0xf]  ;;  %v1505_v10 = vadd.f32 %v1504_v9, %v1492_v34  ;;  %v4155_v9 = vld [vmem:[#allocation8 + $0x290] sm:$0xf0]  ;;  %v4777_v34 = vld [vmem:[#allocation8 + $0x36c] sm:$0xf0]  ;;  %v4250_v16 = vor.u32 %v4773_v42, %v4249_v12 }
 0x114   :  { %v4330_v8 = vor.u32 %v4793_v7, %v4329_v6  ;;  %v4158_v37 = vor.u32 %v4747_v27, %v4155_v9  ;;  %v4017_v14 = vld [vmem:[#allocation8 + $0x168] sm:$0xf]  ;;  %v4769_v27 = vld [vmem:[#allocation8 + $0x32c] sm:$0xf0]  ;;  %v4696_v9 = vld [vmem:[#allocation8 + $0xec] sm:$0xf] }
 0x115   :  { %2563 = vmatpush.bf16.msra.mxu1 %v4014_v23  ;;  %v1517_v15 = vpop.f32.mrf.mxu3  ;;  %v3905_v23 = vld [vmem:[#allocation8 + $0x88] sm:$0xf]  ;;  %v4688_v62 = vld [vmem:[#allocation8 + $0xac] sm:$0xf]  ;;  %v4299_v12 = vld [vmem:[#allocation8 + $0x3b0] sm:$0xf0] }
 0x116   :  { %2533 = vmatpush.bf16.msrb.mxu0 %v4330_v8  ;;  %v1518_v57 = vadd.f32 %v1517_v15, %v1505_v10  ;;  %2574 = vmatpush.bf16.msra.mxu2 %v4174_v17  ;;  %v3906_v38 = vor.u32 %v4686_v26, %v3905_v23  ;;  %v4674_v10 = vld [vmem:[#allocation8 + $0x34] sm:$0xf0]  ;;  %v4233_v26 = vld [vmem:[#allocation8 + $0x320] sm:$0xf] }
 0x117   :  { %2550 = vmatpush.bf16.msra.mxu3 %v3886_v18  ;;  %v4313_v18 = vld [vmem:[#allocation8 + $0x3c0] sm:$0xf]  ;;  %v4714_v15 = vld [vmem:[#allocation8 + $0x174] sm:$0xf0] }
 0x118   :  { %v4314_v48 = vor.u32 %v4789_v19, %v4313_v18  ;;  %v1704_v24 = vmax.f32 %v1518_v57, 0.0  ;;  %v3841_v18 = vld [vmem:[#allocation8 + $0x8] sm:$0xf]  ;;  %v3858_v57 = vor.u32 %v4674_v10, %v3857_v3  ;;  %v4018_v23 = vor.u32 %v4714_v15, %v4017_v14  ;;  %v3907_v10 = vld [vmem:[#allocation8 + $0x98] sm:$0xf0] }
 0x119   :  { %2564 = vmatpush.bf16.msra.mxu1 %v3998_v36  ;;  %v4724_v14 = vld [vmem:[#allocation8 + $0x1cc] sm:$0xf] }
 0x11a   :  { %2534 = vmatpush.bf16.msrb.mxu0 %v4314_v48  ;;  %v5160_v32 = vpack.c.bf16 %v1704_v24, %v1704_v24  ;;  %2575 = vmatpush.bf16.msra.mxu2 %v4158_v37  ;;  %v4091_v48 = vld [vmem:[#allocation8 + $0x210] sm:$0xf0]  ;;  %v4001_v24 = vld [vmem:[#allocation8 + $0x148] sm:$0xf] }
 0x11b   :  { %2551 = vmatpush.bf16.msra.mxu3 %v3870_v30  ;;  %v4297_v30 = vld [vmem:[#allocation8 + $0x3a0] sm:$0xf]  ;;  %v3985_v37 = vld [vmem:[#allocation8 + $0x128] sm:$0xf] }
 0x11c   :  { %v4298_v36 = vor.u32 %v4785_v31, %v4297_v30  ;;  %2515 = vmatmul.bf16.vlgmr.msrb.gmra.mxu1 %v5160_v32  ;;  %v5163_v45 = vpop.f32.mrf.mxu0  ;;  %v3955_v30 = vld [vmem:[#allocation8 + $0xf8] sm:$0xf0]  ;;  %v4234_v31 = vor.u32 %v4769_v27, %v4233_v26  ;;  %v4676_v27 = vld [vmem:[#allocation8 + $0x4c] sm:$0xf] }
 0x11d   :  { %2565 = vmatpush.bf16.msra.mxu1 %v3982_v51  ;;  %v1519_v44 = vpop.f32.mrf.mxu3  ;;  %v4049_v51 = vld [vmem:[#allocation8 + $0x1a8] sm:$0xf]  ;;  %v5165_v55 = vpop.f32.mrf.mxu1  ;;  %v3958_v40 = vor.u32 %v4696_v9, %v3955_v30  ;;  %v3875_v9 = vld [vmem:[#allocation8 + $0x58] sm:$0xf0]  ;;  %v4775_v30 = vld [vmem:[#allocation8 + $0x364] sm:$0xf] }
 0x11e   :  { %2535 = vmatpush.bf16.msrb.mxu0 %v4298_v36  ;;  %v4050_v61 = vor.u32 %v4722_v13, %v4049_v51  ;;  %2576 = vmatpush.bf16.msra.mxu2 %v4142_v49  ;;  %v4706_v36 = vld [vmem:[#allocation8 + $0x134] sm:$0xf0]  ;;  %v3939_v49 = vld [vmem:[#allocation8 + $0xd8] sm:$0xf0]  ;;  %v4331_v51 = vld [vmem:[#allocation8 + $0x3f0] sm:$0xf0] }
 0x11f   :  { %2552 = vmatpush.bf16.msra.mxu3 %v3854_v46  ;;  %v4066_v46 = vor.u32 %v4726_v35, %v4065_v33  ;;  %v321_v33 = vperm.slane %v5133_v54, 4  ;;  %v3842_v35 = vor.u32 %v4670_v21, %v3841_v18  ;;  %v3986_v58 = vor.u32 %v4706_v36, %v3985_v37  ;;  %v3891_v21 = vld [vmem:[#allocation8 + $0x78] sm:$0xf0] }
 0x120   :  { %v4035_v37 = vld [vmem:[#allocation8 + $0x198] sm:$0xf0] }
 0x121   :  { %2566 = vmatpush.bf16.msra.mxu1 %v3966_v1  ;;  %v4266_v1 = vor.u32 %v4777_v34, %v4265_v63  ;;  %v329_v13 = vperm.slane %v321_v33, 0  ;;  %v4787_v63 = vld [vmem:[#allocation8 + $0x3c4] sm:$0xf]  ;;  %v4315_v34 = vld [vmem:[#allocation8 + $0x3d0] sm:$0xf0] }
 0x122   :  { %2536 = vmatpush.bf16.msrb.mxu0 %v4282_v52 }
 0x123   :  { %2553 = vmatpush.bf16.msra.mxu3 %v3838_v29  ;;  %v4126_v29 = vor.u32 %v4739_v59, %v4123_v60  ;;  %v3942_v59 = vor.u32 %v4692_v41, %v3939_v49  ;;  %v3969_v60 = vld [vmem:[#allocation8 + $0x108] sm:$0xf]  ;;  %v3859_v49 = vld [vmem:[#allocation8 + $0x38] sm:$0xf0] }
 0x124   :  { %v1558_v7 = vpop.f32.mrf.mxu0 }
 0x125   :  { %2611 = vmatpush.bf16.msrb.mxu1 %v4082_v28  ;;  %2577 = vmatpush.bf16.msra.mxu2 %v4126_v29  ;;  %v1532_v19 = vpop.f32.mrf.mxu1  ;;  %v4710_v28 = vld [vmem:[#allocation8 + $0x154] sm:$0xf0]  ;;  %v3923_v29 = vld [vmem:[#allocation8 + $0xb8] sm:$0xf0] }
 0x126   :  { %2554 = vmatmul.bf16.vlgmr.msra.gmra.mxu3 %v5153_v53  ;;  %2537 = vmatpush.bf16.msrb.mxu0 %v4266_v1  ;;  %v4083_v1 = vld [vmem:[#allocation8 + $0x1f8] sm:$0xf0]  ;;  %v4680_v19 = vld [vmem:[#allocation8 + $0x6c] sm:$0xf] }
 0x127   :  { %2598 = vmatpush.bf16.msrb.mxu3 %v3954_v0  ;;  %v4033_v0 = vld [vmem:[#allocation8 + $0x188] sm:$0xf]  ;;  %v3894_v26 = vor.u32 %v4680_v19, %v3891_v21  ;;  %v4754_v21 = vld [vmem:[#allocation8 + $0x2b4] sm:$0xf0] }
 0x128   :  { %v4034_v8 = vor.u32 %v4718_v39, %v4033_v0  ;;  %v5169_v17 = vpop.f32.mrf.mxu2  ;;  %v1531_v0 = vadd.f32 %v5165_v55, %v329_v13  ;;  %v4728_v39 = vld [vmem:[#allocation8 + $0x1ec] sm:$0xf]  ;;  %v4067_v55 = vld [vmem:[#allocation8 + $0x1d8] sm:$0xf0] }
 0x129   :  { %2612 = vmatpush.bf16.msrb.mxu1 %v4066_v46  ;;  %v5167_v6 = vpop.f32.mrf.mxu3  ;;  %v4217_v46 = vld [vmem:[#allocation8 + $0x300] sm:$0xf]  ;;  %v4712_v13 = vld [vmem:[#allocation8 + $0x16c] sm:$0xf] }
 0x12a   :  { %2538 = vmatpush.bf16.msrb.mxu0 %v4250_v16  ;;  %v4218_v50 = vor.u32 %v4765_v47, %v4217_v46  ;;  %v1544_v42 = vadd.f32 %v5167_v6, %v1531_v0  ;;  %v4235_v0 = vld [vmem:[#allocation8 + $0x330] sm:$0xf0] }
 0x12b   :  { %2599 = vmatpush.bf16.msrb.mxu3 %v3938_v11  ;;  %v4110_v11 = vor.u32 %v4735_v4, %v4107_v5  ;;  %v3926_v4 = vor.u32 %v4688_v62, %v3923_v29  ;;  %v4684_v5 = vld [vmem:[#allocation8 + $0x8c] sm:$0xf] }
 0x12c   :  { %2567 = vmatmul.bf16.vlgmr.msra.gmra.mxu1 %v5160_v32  ;;  %v5173_v44 = vpop.f32.mrf.mxu0  ;;  %v3910_v18 = vor.u32 %v4684_v5, %v3907_v10  ;;  %v4668_v62 = vld [vmem:[#allocation8 + $0xc] sm:$0xf]  ;;  %v4758_v10 = vld [vmem:[#allocation8 + $0x2d4] sm:$0xf0] }
 0x12d   :  { %2613 = vmatpush.bf16.msrb.mxu1 %v4050_v61  ;;  %2578 = vmatpush.bf16.msra.mxu2 %v4110_v11  ;;  %v4702_v61 = vld [vmem:[#allocation8 + $0x114] sm:$0xf0]  ;;  %v4783_v11 = vld [vmem:[#allocation8 + $0x3a4] sm:$0xf] }
 0x12e   :  { %2539 = vmatpush.bf16.msrb.mxu0 %v4234_v31  ;;  %v3970_v3 = vor.u32 %v4702_v61, %v3969_v60  ;;  %v4302_v15 = vor.u32 %v4783_v11, %v4299_v12  ;;  %v4267_v31 = vld [vmem:[#allocation8 + $0x370] sm:$0xf0]  ;;  %v4209_v60 = vld [vmem:[#allocation8 + $0x2e8] sm:$0xf]  ;;  %v4762_v61 = vld [vmem:[#allocation8 + $0x2f4] sm:$0xf0] }
 0x12f   :  { %2600 = vmatpush.bf16.msrb.mxu3 %v3922_v25  ;;  %v4094_v25 = vor.u32 %v4731_v22, %v4091_v48  ;;  %v4779_v22 = vld [vmem:[#allocation8 + $0x384] sm:$0xf]  ;;  %v4283_v48 = vld [vmem:[#allocation8 + $0x390] sm:$0xf0]  ;;  %v4210_v5 = vor.u32 %v4762_v61, %v4209_v60 }
 0x130   :  { %v1571_v52 = vpop.f32.mrf.mxu2  ;;  %v4286_v6 = vor.u32 %v4779_v22, %v4283_v48  ;;  %v322_v22 = vperm.slane %v5133_v54, 6 }
 0x131   :  { %2614 = vmatpush.bf16.msrb.mxu1 %v4034_v8  ;;  %v1545_v43 = vpop.f32.mrf.mxu3  ;;  %2579 = vmatpush.bf16.msra.mxu2 %v4094_v25  ;;  %v4086_v8 = vor.u32 %v4728_v39, %v4083_v1  ;;  %v4051_v25 = vld [vmem:[#allocation8 + $0x1b8] sm:$0xf0]  ;;  %v4708_v1 = vld [vmem:[#allocation8 + $0x14c] sm:$0xf] }
 0x132   :  { %2540 = vmatpush.bf16.msrb.mxu0 %v4218_v50  ;;  %v4672_v43 = vld [vmem:[#allocation8 + $0x2c] sm:$0xf]  ;;  %v4771_v50 = vld [vmem:[#allocation8 + $0x344] sm:$0xf] }
 0x133   :  { %2601 = vmatpush.bf16.msrb.mxu3 %v3906_v38  ;;  %v4002_v38 = vor.u32 %v4710_v28, %v4001_v24  ;;  %v4720_v24 = vld [vmem:[#allocation8 + $0x1ac] sm:$0xf] }
 0x134   :  { %v1610_v7 = vpop.f32.mrf.mxu0  ;;  %v4054_v28 = vor.u32 %v4720_v24, %v4051_v25  ;;  %v3971_v24 = vld [vmem:[#allocation8 + $0x118] sm:$0xf0] }
 0x135   :  { %2615 = vmatpush.bf16.msrb.mxu1 %v4018_v23  ;;  %v1557_v23 = vadd.f32 %v5163_v45, %v1544_v42  ;;  %v4270_v45 = vor.u32 %v4775_v30, %v4267_v31  ;;  %v4763_v42 = vld [vmem:[#allocation8 + $0x304] sm:$0xf]  ;;  %v4145_v30 = vld [vmem:[#allocation8 + $0x268] sm:$0xf]  ;;  %v4746_v31 = vld [vmem:[#allocation8 + $0x274] sm:$0xf0] }
 0x137   :  { %2602 = vmatpush.bf16.msrb.mxu3 %v3890_v56  ;;  %v4334_v56 = vor.u32 %v4791_v20, %v4331_v51  ;;  %v1570_v33 = vadd.f32 %v5169_v17, %v1557_v23  ;;  %v4251_v20 = vld [vmem:[#allocation8 + $0x350] sm:$0xf0]  ;;  %v4019_v17 = vld [vmem:[#allocation8 + $0x178] sm:$0xf0]  ;;  %v4700_v23 = vld [vmem:[#allocation8 + $0x10c] sm:$0xf] }
 0x138   :  { %v4022_v29 = vor.u32 %v4712_v13, %v4019_v17  ;;  %v4097_v13 = vld [vmem:[#allocation8 + $0x208] sm:$0xf] }
 0x139   :  { %2616 = vmatpush.bf16.msrb.mxu1 %v4002_v38  ;;  %2585 = vmatpush.bf16.msra.mxu0 %v4334_v56  ;;  %v4254_v56 = vor.u32 %v4771_v50, %v4251_v20 }
 0x13b   :  { %2603 = vmatpush.bf16.msrb.mxu3 %v3874_v2  ;;  %v4318_v2 = vor.u32 %v4787_v63, %v4315_v34  ;;  %v3843_v63 = vld [vmem:[#allocation8 + $0x18] sm:$0xf0]  ;;  %v4767_v34 = vld [vmem:[#allocation8 + $0x324] sm:$0xf] }
 0x13d   :  { %2617 = vmatpush.bf16.msrb.mxu1 %v3986_v58  ;;  %2586 = vmatpush.bf16.msra.mxu0 %v4318_v2  ;;  %v1582_v16 = vpop.f32.mrf.mxu1  ;;  %v4003_v2 = vld [vmem:[#allocation8 + $0x158] sm:$0xf0] }
 0x13e   :  { %v1583_v38 = vadd.f32 %v1582_v16, %v1570_v33  ;;  %v4006_v11 = vor.u32 %v4708_v1, %v4003_v2 }
 0x13f   :  { %2604 = vmatpush.bf16.msrb.mxu3 %v3858_v57  ;;  %v4070_v57 = vor.u32 %v4724_v14, %v4067_v55  ;;  %v4219_v14 = vld [vmem:[#allocation8 + $0x310] sm:$0xf0]  ;;  %v4704_v55 = vld [vmem:[#allocation8 + $0x12c] sm:$0xf] }
 0x140   :  { %v5181_v36 = vpop.f32.mrf.mxu0 }
 0x141   :  { %2618 = vmatpush.bf16.msrb.mxu1 %v3970_v3  ;;  %2587 = vmatpush.bf16.msra.mxu0 %v4302_v15  ;;  %v3987_v15 = vld [vmem:[#allocation8 + $0x138] sm:$0xf0] }
 0x142   :  { %v3990_v48 = vor.u32 %v4704_v55, %v3987_v15  ;;  %v4748_v55 = vld [vmem:[#allocation8 + $0x28c] sm:$0xf]  ;;  %v4163_v15 = vld [vmem:[#allocation8 + $0x298] sm:$0xf0] }
 0x143   :  { %2605 = vmatpush.bf16.msrb.mxu3 %v3842_v35  ;;  %v4716_v35 = vld [vmem:[#allocation8 + $0x18c] sm:$0xf] }
 0x144   :  { %2619 = vmatmul.bf16.vlgmr.msrb.gmra.mxu1 %v5160_v32  ;;  %v4038_v47 = vor.u32 %v4716_v35, %v4035_v37  ;;  %v4146_v35 = vor.u32 %v4746_v31, %v4145_v30  ;;  %v4129_v37 = vld [vmem:[#allocation8 + $0x248] sm:$0xf]  ;;  %v4736_v31 = vld [vmem:[#allocation8 + $0x22c] sm:$0xf] }
 0x145   :  { %2663 = vmatpush.bf16.msra.mxu1 %v4086_v8  ;;  %2588 = vmatpush.bf16.msra.mxu0 %v4286_v6  ;;  %v1584_v41 = vpop.f32.mrf.mxu1  ;;  %v4193_v8 = vld [vmem:[#allocation8 + $0x2c8] sm:$0xf] }
 0x146   :  { %2606 = vmatmul.bf16.vlgmr.msrb.gmra.mxu3 %v5153_v53  ;;  %v4194_v19 = vor.u32 %v4758_v10, %v4193_v8  ;;  %v4161_v6 = vld [vmem:[#allocation8 + $0x288] sm:$0xf] }
 0x147   :  { %2650 = vmatpush.bf16.msra.mxu3 %v3958_v40  ;;  %v3878_v40 = vor.u32 %v4676_v27, %v3875_v9  ;;  %v330_v27 = vperm.slane %v322_v22, 0  ;;  %v4113_v41 = vld [vmem:[#allocation8 + $0x228] sm:$0xf]  ;;  %v4147_v22 = vld [vmem:[#allocation8 + $0x278] sm:$0xf0] }
 0x148   :  { %v1621_v52 = vpop.f32.mrf.mxu2  ;;  %v1636_v3 = vpop.f32.mrf.mxu0  ;;  %v4321_v10 = vld [vmem:[#allocation8 + $0x3c8] sm:$0xf] }
 0x149   :  { %2664 = vmatpush.bf16.msra.mxu1 %v4070_v57  ;;  %v1595_v46 = vpop.f32.mrf.mxu3  ;;  %2589 = vmatpush.bf16.msra.mxu0 %v4270_v45  ;;  %v4177_v57 = vld [vmem:[#allocation8 + $0x2a8] sm:$0xf]  ;;  %v1622_v33 = vadd.f32 %v1621_v52, %v330_v27  ;;  %v4742_v45 = vld [vmem:[#allocation8 + $0x254] sm:$0xf0]  ;;  %v4760_v52 = vld [vmem:[#allocation8 + $0x2ec] sm:$0xf] }
 0x14a   :  { %v1596_v51 = vadd.f32 %v1595_v46, %v1583_v38  ;;  %v4178_v25 = vor.u32 %v4754_v21, %v4177_v57  ;;  %v4744_v21 = vld [vmem:[#allocation8 + $0x26c] sm:$0xf]  ;;  %v4273_v27 = vld [vmem:[#allocation8 + $0x368] sm:$0xf] }
 0x14b   :  { %2651 = vmatpush.bf16.msra.mxu3 %v3942_v59  ;;  %v3862_v59 = vor.u32 %v4672_v43, %v3859_v49  ;;  %v4738_v43 = vld [vmem:[#allocation8 + $0x234] sm:$0xf0] }
 0x14c   :  { %v1609_v58 = vadd.f32 %v5173_v44, %v1596_v51  ;;  %v3846_v44 = vor.u32 %v4668_v62, %v3843_v63  ;;  %v4114_v51 = vor.u32 %v4738_v43, %v4113_v41  ;;  %v4756_v62 = vld [vmem:[#allocation8 + $0x2cc] sm:$0xf]  ;;  %v4241_v41 = vld [vmem:[#allocation8 + $0x328] sm:$0xf]  ;;  %v4770_v43 = vld [vmem:[#allocation8 + $0x334] sm:$0xf0] }
 0x14d   :  { %2665 = vmatpush.bf16.msra.mxu1 %v4054_v28  ;;  %2590 = vmatpush.bf16.msra.mxu0 %v4254_v56  ;;  %v3974_v28 = vor.u32 %v4700_v23, %v3971_v24  ;;  %v4211_v56 = vld [vmem:[#allocation8 + $0x2f8] sm:$0xf0]  ;;  %v4782_v23 = vld [vmem:[#allocation8 + $0x394] sm:$0xf0]  ;;  %v4150_v24 = vor.u32 %v4744_v21, %v4147_v22 }
 0x14e   :  { %v1705_v39 = vmax.f32 %v1609_v58, 0.0  ;;  %v4214_v60 = vor.u32 %v4760_v52, %v4211_v56  ;;  %v4788_v52 = vld [vmem:[#allocation8 + $0x3cc] sm:$0xf]  ;;  %v4323_v56 = vld [vmem:[#allocation8 + $0x3d8] sm:$0xf0] }
 0x14f   :  { %2652 = vmatpush.bf16.msra.mxu3 %v3926_v4  ;;  %v4238_v4 = vor.u32 %v4767_v34, %v4235_v0  ;;  %v4337_v0 = vld [vmem:[#allocation8 + $0x3e8] sm:$0xf] }
 0x150   :  { %v5184_v7 = vpack.c.bf16 %v1705_v39, %v1705_v39  ;;  %v1623_v16 = vpop.f32.mrf.mxu2  ;;  %v4794_v39 = vld [vmem:[#allocation8 + $0x3f4] sm:$0xf0] }
 0x151   :  { %2666 = vmatpush.bf16.msra.mxu1 %v4038_v47  ;;  %v1597_v12 = vpop.f32.mrf.mxu3  ;;  %2591 = vmatpush.bf16.msra.mxu0 %v4238_v4  ;;  %v4338_v4 = vor.u32 %v4794_v39, %v4337_v0  ;;  %v4305_v16 = vld [vmem:[#allocation8 + $0x3a8] sm:$0xf]  ;;  %v4776_v39 = vld [vmem:[#allocation8 + $0x36c] sm:$0xf] }
 0x152   :  { %2528 = vmatmul.bf16.vlgmr.msrb.gmra.mxu2 %v5184_v7 }
 0x153   :  { %2653 = vmatpush.bf16.msra.mxu3 %v3910_v18  ;;  %v4222_v18 = vor.u32 %v4763_v42, %v4219_v14  ;;  %2624 = vmatpush.bf16.msrb.mxu2 %v4210_v5  ;;  %v4752_v5 = vld [vmem:[#allocation8 + $0x2ac] sm:$0xf] }
 0x155   :  { %2667 = vmatpush.bf16.msra.mxu1 %v4022_v29  ;;  %2592 = vmatpush.bf16.msra.mxu0 %v4222_v18  ;;  %v4195_v29 = vld [vmem:[#allocation8 + $0x2d8] sm:$0xf0]  ;;  %v4786_v18 = vld [vmem:[#allocation8 + $0x3b4] sm:$0xf0] }
 0x156   :  { %v4198_v3 = vor.u32 %v4756_v62, %v4195_v29  ;;  %v4306_v57 = vor.u32 %v4786_v18, %v4305_v16  ;;  %v4764_v16 = vld [vmem:[#allocation8 + $0x30c] sm:$0xf]  ;;  %v4227_v18 = vld [vmem:[#allocation8 + $0x318] sm:$0xf0] }
 0x157   :  { %2654 = vmatpush.bf16.msra.mxu3 %v3894_v26  ;;  %2625 = vmatpush.bf16.msrb.mxu2 %v4194_v19  ;;  %v4750_v26 = vld [vmem:[#allocation8 + $0x294] sm:$0xf0]  ;;  %v4166_v19 = vor.u32 %v4748_v55, %v4163_v15  ;;  %v4230_v21 = vor.u32 %v4764_v16, %v4227_v18  ;;  %v4824_v16 = vld [vmem:[#allocation11 + $0xe8] sm:$0xff] }
 0x158   :  { %v4162_v9 = vor.u32 %v4750_v26, %v4161_v6  ;;  %v4740_v6 = vld [vmem:[#allocation8 + $0x24c] sm:$0xf]  ;;  %v4131_v26 = vld [vmem:[#allocation8 + $0x258] sm:$0xf0] }
 0x159   :  { %2668 = vmatpush.bf16.msra.mxu1 %v4006_v11  ;;  %v4790_v11 = vld [vmem:[#allocation8 + $0x3d4] sm:$0xf0] }
 0x15a   :  { %v4322_v14 = vor.u32 %v4790_v11, %v4321_v10 }
 0x15b   :  { %2655 = vmatpush.bf16.msra.mxu3 %v3878_v40  ;;  %2626 = vmatpush.bf16.msrb.mxu2 %v4178_v25  ;;  %v4130_v40 = vor.u32 %v4742_v45, %v4129_v37 }
 0x15d   :  { %2669 = vmatpush.bf16.msra.mxu1 %v3990_v48  ;;  %v1647_v54 = vpop.f32.mrf.mxu1  ;;  %v4289_v48 = vld [vmem:[#allocation8 + $0x388] sm:$0xf] }
 0x15e   :  { %v4290_v25 = vor.u32 %v4782_v23, %v4289_v48 }
 0x15f   :  { %2656 = vmatpush.bf16.msra.mxu3 %v3862_v59  ;;  %2627 = vmatpush.bf16.msrb.mxu2 %v4162_v9  ;;  %v4134_v9 = vor.u32 %v4740_v6, %v4131_v26  ;;  %v4802_v6 = vld [vmem:[#allocation11 + $0x38] sm:$0xff] }
 0x160   :  { %v1686_v38 = vpop.f32.mrf.mxu0 }
 0x161   :  { %2670 = vmatpush.bf16.msra.mxu1 %v3974_v28  ;;  %v4778_v28 = vld [vmem:[#allocation8 + $0x374] sm:$0xf0] }
 0x162   :  { %2580 = vmatmul.bf16.vlgmr.msra.gmra.mxu2 %v5184_v7  ;;  %v4274_v30 = vor.u32 %v4778_v28, %v4273_v27  ;;  %v4801_v28 = vld [vmem:[#allocation11 + $0x30] sm:$0xff] }
 0x163   :  { %2657 = vmatpush.bf16.msra.mxu3 %v3846_v44  ;;  %2628 = vmatpush.bf16.msrb.mxu2 %v4146_v35  ;;  %v4179_v44 = vld [vmem:[#allocation8 + $0x2b8] sm:$0xf0]  ;;  %v4774_v35 = vld [vmem:[#allocation8 + $0x354] sm:$0xf0] }
 0x164   :  { %2671 = vmatmul.bf16.vlgmr.msra.gmra.mxu1 %v5160_v32  ;;  %v4734_v32 = vld [vmem:[#allocation8 + $0x214] sm:$0xf0]  ;;  %v4182_v12 = vor.u32 %v4752_v5, %v4179_v44  ;;  %v4259_v5 = vld [vmem:[#allocation8 + $0x358] sm:$0xf0] }
 0x165   :  { %v1649_v47 = vpop.f32.mrf.mxu1  ;;  %v4098_v59 = vor.u32 %v4734_v32, %v4097_v13  ;;  %v4339_v13 = vld [vmem:[#allocation8 + $0x3f8] sm:$0xf0] }
 0x166   :  { %2658 = vmatmul.bf16.vlgmr.msra.gmra.mxu3 %v5153_v53  ;;  %v1635_v53 = vadd.f32 %v5181_v36, %v1622_v33  ;;  %v4115_v33 = vld [vmem:[#allocation8 + $0x238] sm:$0xf0]  ;;  %v4242_v47 = vor.u32 %v4770_v43, %v4241_v41  ;;  %v4796_v41 = vld [vmem:[#allocation11 + $0x8] sm:$0xff] }
 0x167   :  { %2629 = vmatpush.bf16.msrb.mxu2 %v4130_v40  ;;  %v4118_v45 = vor.u32 %v4736_v31, %v4115_v33  ;;  %v4099_v40 = vld [vmem:[#allocation8 + $0x218] sm:$0xf0]  ;;  %2969 = vmatpush.bf16.msrb.mxu3 %v4802_v6  ;;  %v4800_v31 = vld [vmem:[#allocation11 + $0x28] sm:$0xff] }
 0x168   :  { %v1648_v46 = vadd.f32 %v1647_v54, %v1635_v53  ;;  %v1673_v20 = vpop.f32.mrf.mxu2  ;;  %v1688_v36 = vpop.f32.mrf.mxu0  ;;  %v4257_v54 = vld [vmem:[#allocation8 + $0x348] sm:$0xf]  ;;  %v4808_v43 = vld [vmem:[#allocation11 + $0x68] sm:$0xff] }
 0x169   :  { %v1660_v49 = vpop.f32.mrf.mxu3  ;;  %v4258_v53 = vor.u32 %v4774_v35, %v4257_v54  ;;  %v1839_v36 = vld [vmem:[#allocation10] sm:$0xf]  ;;  %v4799_v35 = vld [vmem:[#allocation11 + $0x20] sm:$0xff] }
 0x16a   :  { %v1661_v50 = vadd.f32 %v1660_v49, %v1648_v46  ;;  %v4225_v49 = vld [vmem:[#allocation8 + $0x308] sm:$0xf] }
 0x16b   :  { %2630 = vmatpush.bf16.msrb.mxu2 %v4114_v51  ;;  %v4792_v51 = vld [vmem:[#allocation8 + $0x3ec] sm:$0xf]  ;;  %2970 = vmatpush.bf16.msrb.mxu3 %v4801_v28  ;;  %v4819_v28 = vld [vmem:[#allocation11 + $0xc0] sm:$0xff] }
 0x16c   :  { %v1674_v17 = vadd.f32 %v1673_v20, %v1661_v50  ;;  %v4766_v50 = vld [vmem:[#allocation8 + $0x314] sm:$0xf0] }
 0x16d   :  { %v1699_v61 = vpop.f32.mrf.mxu1  ;;  %v4226_v32 = vor.u32 %v4766_v50, %v4225_v49  ;;  %v4807_v49 = vld [vmem:[#allocation11 + $0x60] sm:$0xff] }
 0x16e   :  { %v1687_v58 = vadd.f32 %v1686_v38, %v1674_v17  ;;  %v4732_v38 = vld [vmem:[#allocation8 + $0x20c] sm:$0xf]  ;;  %v4342_v17 = vor.u32 %v4792_v51, %v4339_v13  ;;  %v4806_v51 = vld [vmem:[#allocation11 + $0x58] sm:$0xff] }
 0x16f   :  { %2631 = vmatpush.bf16.msrb.mxu2 %v4098_v59  ;;  %v4102_v46 = vor.u32 %v4732_v38, %v4099_v40  ;;  %v5198_v59 = vunpack.c.l.bf16 %v1839_v36  ;;  %2971 = vmatpush.bf16.msrb.mxu3 %v4800_v31  ;;  %v4797_v38 = vld [vmem:[#allocation11 + $0x10] sm:$0xff]  ;;  %v4818_v13 = vld [vmem:[#allocation11 + $0xb8] sm:$0xff] }
 0x170   :  { %v1700_v63 = vadd.f32 %v1699_v61, %v1687_v58  ;;  %v1675_v1 = vpop.f32.mrf.mxu2  ;;  %v4326_v58 = vor.u32 %v4788_v52, %v4323_v56  ;;  %v4307_v61 = vld [vmem:[#allocation8 + $0x3b8] sm:$0xf0]  ;;  %v4809_v40 = vld [vmem:[#allocation11 + $0x70] sm:$0xff] }
 0x171   :  { %v1662_v34 = vpop.f32.mrf.mxu3  ;;  %v1842_v29 = vperm.slane %v5198_v59, 0  ;;  %v4275_v1 = vld [vmem:[#allocation8 + $0x378] sm:$0xf0]  ;;  %v1843_v15 = vperm.slane %v5198_v59, 2  ;;  %v4805_v52 = vld [vmem:[#allocation11 + $0x50] sm:$0xff] }
 0x172   :  { %v1706_v2 = vmax.f32 %v1700_v63, 0.0  ;;  %2632 = vmatmul.bf16.vlgmr.msrb.gmra.mxu2 %v5184_v7  ;;  %v4780_v63 = vld [vmem:[#allocation8 + $0x38c] sm:$0xf]  ;;  %v4291_v34 = vld [vmem:[#allocation8 + $0x398] sm:$0xf0]  ;;  %v4817_v56 = vld [vmem:[#allocation11 + $0xb0] sm:$0xff] }
 0x173   :  { %2676 = vmatpush.bf16.msra.mxu2 %v4214_v60  ;;  %v4784_v60 = vld [vmem:[#allocation8 + $0x3ac] sm:$0xf]  ;;  %v1850_v0 = vperm.slane %v1842_v29, 0  ;;  %v1851_v22 = vperm.slane %v1843_v15, 0  ;;  %2972 = vmatpush.bf16.msrb.mxu3 %v4799_v35  ;;  %v4803_v29 = vld [vmem:[#allocation11 + $0x40] sm:$0xff] }
 0x174   :  { %v5192_v8 = vpack.c.bf16 %v1706_v2, %v1706_v2  ;;  %v4310_v62 = vor.u32 %v4784_v60, %v4307_v61  ;;  %v4278_v2 = vor.u32 %v4776_v39, %v4275_v1  ;;  %v4816_v61 = vld [vmem:[#allocation11 + $0xa8] sm:$0xff]  ;;  %v4813_v39 = vld [vmem:[#allocation11 + $0x90] sm:$0xff] }
 0x175   :  { %v1701_v42 = vpop.f32.mrf.mxu1 }
 0x176   :  { %2541 = vmatmul.bf16.vlgmr.msrb.gmra.mxu0 %v5192_v8  ;;  %v4768_v42 = vld [vmem:[#allocation8 + $0x32c] sm:$0xf] }
 0x177   :  { %2677 = vmatpush.bf16.msra.mxu2 %v4198_v3  ;;  %2637 = vmatpush.bf16.msrb.mxu0 %v4338_v4  ;;  %v4772_v4 = vld [vmem:[#allocation8 + $0x34c] sm:$0xf] }
 0x17b   :  { %2678 = vmatpush.bf16.msra.mxu2 %v4182_v12  ;;  %2638 = vmatpush.bf16.msrb.mxu0 %v4322_v14  ;;  %v4262_v12 = vor.u32 %v4772_v4, %v4259_v5  ;;  %v4243_v14 = vld [vmem:[#allocation8 + $0x338] sm:$0xf0] }
 0x17c   :  { %v4246_v55 = vor.u32 %v4768_v42, %v4243_v14 }
 0x17f   :  { %2679 = vmatpush.bf16.msra.mxu2 %v4166_v19  ;;  %2639 = vmatpush.bf16.msrb.mxu0 %v4306_v57 }
 0x183   :  { %2680 = vmatpush.bf16.msra.mxu2 %v4150_v24  ;;  %2640 = vmatpush.bf16.msrb.mxu0 %v4290_v25  ;;  %v1844_v25 = vperm.slane %v5198_v59, 4 }
 0x185   :  { %v1852_v27 = vperm.slane %v1844_v25, 0  ;;  %v4821_v25 = vld [vmem:[#allocation11 + $0xd0] sm:$0xff] }
 0x186   :  { %2593 = vmatmul.bf16.vlgmr.msra.gmra.mxu0 %v5192_v8 }
 0x187   :  { %2681 = vmatpush.bf16.msra.mxu2 %v4134_v9  ;;  %2641 = vmatpush.bf16.msrb.mxu0 %v4274_v30 }
 0x189   :  { %v2503_v37 = vpop.f32.mrf.mxu3 }
 0x18a   :  { %v2504_v3 = vadd.f32 %v2503_v37, %v1850_v0  ;;  %v4814_v0 = vld [vmem:[#allocation11 + $0x98] sm:$0xff] }
 0x18b   :  { %2682 = vmatpush.bf16.msra.mxu2 %v4118_v45  ;;  %2642 = vmatpush.bf16.msrb.mxu0 %v4258_v53  ;;  %v4798_v45 = vld [vmem:[#allocation11 + $0x18] sm:$0xff] }
 0x18c   :  { %2973 = vmatpush.bf16.msrb.mxu3 %v4798_v45 }
 0x18f   :  { %2683 = vmatpush.bf16.msra.mxu2 %v4102_v46  ;;  %2643 = vmatpush.bf16.msrb.mxu0 %v4242_v47  ;;  %v1845_v46 = vperm.slane %v5198_v59, 6  ;;  %v4795_v47 = vld [vmem:[#allocation11] sm:$0xff]  ;;  %v4804_v59 = vld [vmem:[#allocation11 + $0x48] sm:$0xff] }
 0x190   :  { %2974 = vmatpush.bf16.msrb.mxu3 %v4797_v38 }
 0x191   :  { %v2505_v20 = vpop.f32.mrf.mxu3 }
 0x192   :  { %2684 = vmatmul.bf16.vlgmr.msra.gmra.mxu2 %v5184_v7  ;;  %v4294_v7 = vor.u32 %v4780_v63, %v4291_v34  ;;  %v1853_v20 = vperm.slane %v1845_v46, 0  ;;  %v4815_v63 = vld [vmem:[#allocation11 + $0xa0] sm:$0xff] }
 0x193   :  { %2644 = vmatpush.bf16.msrb.mxu0 %v4226_v32  ;;  %2995 = vmatpush.bf16.msrb.mxu2 %v4818_v13 }
 0x194   :  { %2975 = vmatpush.bf16.msrb.mxu3 %v4796_v41 }
 0x196   :  { %2645 = vmatmul.bf16.vlgmr.msrb.gmra.mxu0 %v5192_v8 }
 0x197   :  { %2689 = vmatpush.bf16.msra.mxu0 %v4342_v17  ;;  %2996 = vmatpush.bf16.msrb.mxu2 %v4817_v56 }
 0x198   :  { %2976 = vmatpush.bf16.msrb.mxu3 %v4795_v47 }
 0x199   :  { %v2516_v44 = vpop.f32.mrf.mxu1 }
 0x19a   :  { %v5202_v11 = vadd.f32 %v2516_v44, %v2504_v3  ;;  %v4812_v3 = vld [vmem:[#allocation11 + $0x88] sm:$0xff] }
 0x19b   :  { %2690 = vmatpush.bf16.msra.mxu0 %v4326_v58  ;;  %2997 = vmatpush.bf16.msrb.mxu2 %v4816_v61 }
 0x19f   :  { %2691 = vmatpush.bf16.msra.mxu0 %v4310_v62  ;;  %2998 = vmatpush.bf16.msrb.mxu2 %v4815_v63 }
 0x1a1   :  { %v2518_v19 = vpop.f32.mrf.mxu1 }
 0x1a2   :  { %v4823_v19 = vld [vmem:[#allocation11 + $0xe0] sm:$0xff] }
 0x1a3   :  { %2692 = vmatpush.bf16.msra.mxu0 %v4294_v7  ;;  %2999 = vmatpush.bf16.msrb.mxu2 %v4814_v0 }
 0x1a7   :  { %2693 = vmatpush.bf16.msra.mxu0 %v4278_v2  ;;  %3000 = vmatpush.bf16.msrb.mxu2 %v4813_v39 }
 0x1a9   :  { %v2555_v10 = vpop.f32.mrf.mxu3  ;;  %v2568_v23 = vpop.f32.mrf.mxu1 }
 0x1aa   :  { %v2556_v48 = vadd.f32 %v2555_v10, %v1851_v22  ;;  %v4811_v10 = vld [vmem:[#allocation11 + $0x80] sm:$0xff]  ;;  %v4822_v22 = vld [vmem:[#allocation11 + $0xd8] sm:$0xff] }
 0x1ab   :  { %2694 = vmatpush.bf16.msra.mxu0 %v4262_v12  ;;  %3001 = vmatpush.bf16.msrb.mxu2 %v4812_v3  ;;  %v4826_v12 = vld [vmem:[#allocation11 + $0xf8] sm:$0xff] }
 0x1ac   :  { %v5205_v24 = vadd.f32 %v2568_v23, %v2556_v48 }
 0x1af   :  { %2695 = vmatpush.bf16.msra.mxu0 %v4246_v55  ;;  %3002 = vmatpush.bf16.msrb.mxu2 %v4811_v10  ;;  %v4825_v55 = vld [vmem:[#allocation11 + $0xf0] sm:$0xff] }
 0x1b1   :  { %v2557_v57 = vpop.f32.mrf.mxu3  ;;  %v2570_v26 = vpop.f32.mrf.mxu1 }
 0x1b2   :  { %v4820_v26 = vld [vmem:[#allocation11 + $0xc8] sm:$0xff] }
 0x1b3   :  { %2696 = vmatpush.bf16.msra.mxu0 %v4230_v21 }
 0x1b6   :  { %2697 = vmatmul.bf16.vlgmr.msra.gmra.mxu0 %v5192_v8  ;;  %v4810_v8 = vld [vmem:[#allocation11 + $0x78] sm:$0xff] }
 0x1b7   :  { %2982 = vmatpush.bf16.msrb.mxu1 %v4810_v8  ;;  %3008 = vmatpush.bf16.msrb.mxu0 %v4826_v12 }
 0x1bb   :  { %2983 = vmatpush.bf16.msrb.mxu1 %v4809_v40  ;;  %3009 = vmatpush.bf16.msrb.mxu0 %v4825_v55 }
 0x1bf   :  { %2984 = vmatpush.bf16.msrb.mxu1 %v4808_v43  ;;  %3010 = vmatpush.bf16.msrb.mxu0 %v4824_v16 }
 0x1c1   :  { %v2620_v33 = vpop.f32.mrf.mxu1 }
 0x1c3   :  { %2985 = vmatpush.bf16.msrb.mxu1 %v4807_v49  ;;  %3011 = vmatpush.bf16.msrb.mxu0 %v4823_v19 }
 0x1c7   :  { %2986 = vmatpush.bf16.msrb.mxu1 %v4806_v51  ;;  %3012 = vmatpush.bf16.msrb.mxu0 %v4822_v22 }
 0x1c9   :  { %v2607_v9 = vpop.f32.mrf.mxu3  ;;  %v2622_v53 = vpop.f32.mrf.mxu1 }
 0x1ca   :  { %v2608_v30 = vadd.f32 %v2607_v9, %v1852_v27 }
 0x1cb   :  { %2987 = vmatpush.bf16.msrb.mxu1 %v4805_v52  ;;  %3013 = vmatpush.bf16.msrb.mxu0 %v4821_v25 }
 0x1cc   :  { %v5209_v54 = vadd.f32 %v2620_v33, %v2608_v30 }
 0x1cf   :  { %2988 = vmatpush.bf16.msrb.mxu1 %v4804_v59  ;;  %3014 = vmatpush.bf16.msrb.mxu0 %v4820_v26 }
 0x1d1   :  { %v2609_v37 = vpop.f32.mrf.mxu3 }
 0x1d3   :  { %2989 = vmatpush.bf16.msrb.mxu1 %v4803_v29  ;;  %3015 = vmatpush.bf16.msrb.mxu0 %v4819_v28 }
 0x1d5   :  { %v2529_v50 = vpop.f32.mrf.mxu2 }
 0x1d6   :  { %v2530_v2 = vadd.f32 %v2529_v50, %v5202_v11  ;;  %v2774_v50 = vld [vmem:[%s5230_s6] sm:$0x1] }
 0x1d7   :  { %v2775_v51 = vunpack.c.l.bf16 %v2774_v50 }
 0x1d9   :  { %v2776_v13 = vperm.slane %v2775_v51, 0 }
 0x1dd   :  { %v2531_v58 = vpop.f32.mrf.mxu2 }
 0x1e1   :  { %v2672_v36 = vpop.f32.mrf.mxu1 }
 0x1e5   :  { %v2581_v7 = vpop.f32.mrf.mxu2 }
 0x1e6   :  { %v2582_v11 = vadd.f32 %v2581_v7, %v5205_v24 }
 0x1e9   :  { %v2659_v32 = vpop.f32.mrf.mxu3  ;;  %v2674_v34 = vpop.f32.mrf.mxu1 }
 0x1ea   :  { %v2660_v17 = vadd.f32 %v2659_v32, %v1853_v20 }
 0x1ec   :  { %v5212_v60 = vadd.f32 %v2672_v36, %v2660_v17 }
 0x1ed   :  { %v2583_v1 = vpop.f32.mrf.mxu2 }
 0x1f1   :  { %v2661_v62 = vpop.f32.mrf.mxu3 }
 0x1f3   :  { %v2542_v4 = vpop.f32.mrf.mxu0 }
 0x1f4   :  { %v2543_v5 = vadd.f32 %v2542_v4, %v2530_v2 }
 0x1f5   :  { %v2633_v42 = vpop.f32.mrf.mxu2 }
 0x1f6   :  { %v2702_v44 = vmax.f32 %v2543_v5, 0.0  ;;  %v2634_v27 = vadd.f32 %v2633_v42, %v5209_v54 }
 0x1f8   :  { %v2706_v14 = vpack.c.bf16 %v2702_v44, %v2702_v44 }
 0x1fa   :  { %2977 = vmatmul.bf16.vlgmr.msrb.gmra.mxu3 %v2706_v14 }
 0x1fb   :  { %v2544_v15 = vpop.f32.mrf.mxu0 }
 0x1fd   :  { %v2635_v18 = vpop.f32.mrf.mxu2 }
 0x203   :  { %v2594_v57 = vpop.f32.mrf.mxu0 }
 0x204   :  { %v2595_v21 = vadd.f32 %v2594_v57, %v2582_v11 }
 0x206   :  { %v2703_v48 = vmax.f32 %v2595_v21, 0.0 }
 0x208   :  { %v2707_v23 = vpack.c.bf16 %v2703_v48, %v2703_v48 }
 0x20a   :  { %2990 = vmatmul.bf16.vlgmr.msrb.gmra.mxu1 %v2707_v23 }
 0x20b   :  { %v2596_v6 = vpop.f32.mrf.mxu0 }
 0x213   :  { %v2646_v9 = vpop.f32.mrf.mxu0 }
 0x214   :  { %v2647_v30 = vadd.f32 %v2646_v9, %v2634_v27 }
 0x215   :  { %v2685_v31 = vpop.f32.mrf.mxu2 }
 0x216   :  { %v2704_v24 = vmax.f32 %v2647_v30, 0.0  ;;  %v2686_v45 = vadd.f32 %v2685_v31, %v5212_v60 }
 0x218   :  { %v2708_v33 = vpack.c.bf16 %v2704_v24, %v2704_v24 }
 0x21a   :  { %3003 = vmatmul.bf16.vlgmr.msrb.gmra.mxu2 %v2708_v33 }
 0x21b   :  { %v2648_v35 = vpop.f32.mrf.mxu0 }
 0x21d   :  { %v2687_v37 = vpop.f32.mrf.mxu2 }
 0x233   :  { %v2698_v8 = vpop.f32.mrf.mxu0 }
 0x234   :  { %v2699_v53 = vadd.f32 %v2698_v8, %v2686_v45 }
 0x236   :  { %v2705_v38 = vmax.f32 %v2699_v53, 0.0 }
 0x238   :  { %v2709_v40 = vpack.c.bf16 %v2705_v38, %v2705_v38 }
 0x23a   :  { %3016 = vmatmul.bf16.vlgmr.msrb.gmra.mxu0 %v2709_v40 }
 0x23b   :  { %v2700_v41 = vpop.f32.mrf.mxu0 }
 0x27d   :  { %v2978_v43 = vpop.f32.mrf.mxu3 }
 0x27e   :  { %v2979_v32 = vadd.f32 %v2978_v43, %v2776_v13 }
 0x285   :  { %v2980_v54 = vpop.f32.mrf.mxu3 }
 0x287   :  { %v2991_v46 = vpop.f32.mrf.mxu1 }
 0x288   :  { %v2992_v17 = vadd.f32 %v2991_v46, %v2979_v32 }
 0x28f   :  { %v2993_v47 = vpop.f32.mrf.mxu1 }
 0x29d   :  { %v3004_v49 = vpop.f32.mrf.mxu2 }
 0x29e   :  { %v3005_v52 = vadd.f32 %v3004_v49, %v2992_v17 }
 0x2a5   :  { %v3006_v20 = vpop.f32.mrf.mxu2 }
 0x2b7   :  { %v3017_v56 = vpop.f32.mrf.mxu0 }
 0x2b8   :  { %v3018_v36 = vadd.f32 %v3017_v56, %v3005_v52 }
 0x2ba   :  { %v3021_v58 = vpack.c.bf16 %v3018_v36, %v3018_v36 }
 0x2bc   :  { %3022 = vst [vmem:[#allocation13] sm:$0xf] %v3021_v58 }
 0x2bd   :  { %3033 = dma.vmem_to_hbm [thread:$0]  %s3029_s9, 64, %s3031_s12, [#allocation4]  }
 0x2bf   :  { %v3019_v60 = vpop.f32.mrf.mxu0 }
 0x2c0   :  { %5014 = dma.done.wait [#allocation4], 64  }
 0x2c1   :  { %5015 = vsyncadd [#allocation4], 4294967232 }
 0x2c2   :  { %3038 = vsyncpa [#allocation3], 1 }
 0x2c3   :  { %3039 = vsyncpa [#allocation6], 1 }
 0x2c4   :  { %3040 = vsyncpa [#allocation9], 1 }
 0x2c5   :  { %3041 = vsyncpa [#allocation12], 1 }
 0x2c6   :  { %3042 = vsyncpa [#allocation4], 1 }

</bundles_post_ra>
